<compile_context>
chip_gen: v6e
topology: v6e:2x2x1
jax: 0.10.0
libtpu: 0.0.40
codegen_flags: <defaults>
</compile_context>

<pallas_src>
import functools

import jax
import jax.numpy as jnp
from jax.experimental import pallas as pl
from jax.experimental.pallas import tpu as pltpu

EPS = 1e-5


def _round_up(x, m):
    return (x + m - 1) // m * m


def _cdiv(a, b):
    return -(-a // b)


def _choose_tiling(P, max_rows):
    """Split one image's P patch rows into n tiles of tp rows (n * tp >= P)."""
    if P <= max_rows:
        return P, 1                      # one tile covers a whole image
    # MXU-aligned tiles (multiple of 256 on v6e/v7x); 16 keeps bf16 sublane
    # packing dense for small configs.
    align = 256 if max_rows >= 256 else 16
    tp = _round_up(_cdiv(P, _cdiv(P, max_rows)), align)
    return tp, _cdiv(P, tp)


# ---------------------------------------------------------------------------
# Kernel: one (image, patch-row-tile) step of patch-embed GEMM + pos/bias add
#         + LayerNorm.  bf16 in / f32 accumulate + f32 LN / bf16 out.
# ---------------------------------------------------------------------------

def patch_tokens_kernel(p_ref, w_ref, posb_ref, g_ref, b_ref, o_ref, *,
                        tp, n_ptiles):
    """
    p_ref:    (1, tp, K)           bf16  im2col'd patches of one image tile
    w_ref:    (K, E)               bf16  patch-embed weight (resident)
    posb_ref: (n_ptiles*tp | P, E) bf16  pos_embed[1:] + conv bias (resident)
    g_ref, b_ref: (1, E)           f32   LayerNorm affine (resident)
    o_ref:    (1, tp, E)           bf16  normalized patch tokens
    """
    # bf16 MXU matmul with f32 accumulation.
    x = jnp.dot(p_ref[0], w_ref[...], preferred_element_type=jnp.float32)

    if n_ptiles == 1:
        posb = posb_ref[...]
    else:
        start = pl.multiple_of(pl.program_id(1) * tp, 16)
        posb = posb_ref[pl.ds(start, tp), :]
    x = x + posb.astype(jnp.float32)

    # LayerNorm kept entirely in f32 (v5e has no bf16 VPU/EUP path).
    mean = jnp.mean(x, axis=-1, keepdims=True)
    xc = x - mean
    var = jnp.mean(xc * xc, axis=-1, keepdims=True)
    y = xc * jax.lax.rsqrt(var + EPS) * g_ref[...] + b_ref[...]

    o_ref[0] = y.astype(o_ref.dtype)     # bf16 store (halves writeback bytes)


# ---------------------------------------------------------------------------
# Parameter prep (done once, not per forward)
# ---------------------------------------------------------------------------

def _cls_feature(params):
    """LN(cls_token + pos_embed[0]) * gamma + beta, (1, E) f32.

    Image independent for the BasicTransformer fallback (per-token LayerNorm),
    so it is computed once in plain jnp rather than a (1, E) Pallas launch."""
    E = params["gamma"].shape[0]
    x = (params["cls"].reshape(1, E) + params["pos"][0, 0:1, :]).astype(jnp.float32)
    mean = jnp.mean(x, axis=-1, keepdims=True)
    xc = x - mean
    var = jnp.mean(xc * xc, axis=-1, keepdims=True)
    xn = xc * jax.lax.rsqrt(var + EPS)
    return xn * params["gamma"].reshape(1, E) + params["beta"].reshape(1, E)


def prepare_params(params):
    """One-time prep: weight transpose + bf16 cast, pos+bias fold (bf16),
    LN affine reshape, and the image-independent cls feature."""
    E = params["w"].shape[0]
    ps = int(params["w"].shape[-1])
    return {
        "wT": params["w"].reshape(E, -1).T.astype(jnp.bfloat16),         # (K, E)
        "posb": (params["pos"][0, 1:, :]
                 + params["b"][None, :]).astype(jnp.bfloat16),           # (P, E)
        "gamma": params["gamma"].reshape(1, E).astype(jnp.float32),
        "beta": params["beta"].reshape(1, E).astype(jnp.float32),
        "cls_feat": _cls_feature(params),                                # (1, E)
        "patch_size": ps,
        "embed_dim": E,
    }


# ---------------------------------------------------------------------------
# Wrappers
# ---------------------------------------------------------------------------

def _patch_tokens(x, prepped, max_rows=2048):
    """Normalized patch tokens LN(patch_embed(x)+b+pos[1:]) -> (B, P, E) bf16."""
    B, C, H, W = x.shape
    ps = prepped["patch_size"]
    Hp, Wp = H // ps, W // ps
    P = Hp * Wp
    K, E = prepped["wT"].shape
    assert prepped["posb"].shape[0] == P, "pos_embed / image size mismatch"

    # im2col: single fused bf16 cast + transpose pass.  No M/K padding copies
    # of the activations (tiles never straddle images; partial tiles are
    # handled by Pallas' masked reads/writes).
    xp = (x.astype(jnp.bfloat16)
            .reshape(B, C, Hp, ps, Wp, ps)
            .transpose(0, 2, 4, 1, 3, 5)
            .reshape(B, P, K))

    tp, n_ptiles = _choose_tiling(P, max_rows)

    posb = prepped["posb"]
    if n_ptiles * tp != P:
        # Parameter-sized pad only (never the activations); keeps the
        # in-kernel pl.ds slice of the resident block in bounds.
        posb = jnp.pad(posb, ((0, n_ptiles * tp - P), (0, 0)))

    cost = pl.CostEstimate(
        flops=2 * B * P * K * E,
        transcendentals=B * P,                       # one rsqrt per token row
        bytes_accessed=(xp.size * 2                  # bf16 patches, read once
                        + prepped["wT"].size * 2     # bf16 weight, resident
                        + posb.size * 2              # bf16 pos+bias, resident
                        + 2 * E * 4                  # gamma, beta
                        + B * P * E * 2),            # bf16 output writeback
    )

    kernel = functools.partial(patch_tokens_kernel, tp=tp, n_ptiles=n_ptiles)
    out = pl.pallas_call(
        kernel,
        out_shape=jax.ShapeDtypeStruct((B, P, E), jnp.bfloat16),
        grid=(B, n_ptiles),
        in_specs=[
            pl.BlockSpec((1, tp, K), lambda b, j: (b, j, 0)),
            pl.BlockSpec((K, E), lambda b, j: (0, 0)),          # resident
            pl.BlockSpec(posb.shape, lambda b, j: (0, 0)),      # resident
            pl.BlockSpec((1, E), lambda b, j: (0, 0)),          # resident
            pl.BlockSpec((1, E), lambda b, j: (0, 0)),          # resident
        ],
        out_specs=pl.BlockSpec((1, tp, E), lambda b, j: (b, j, 0)),
        compiler_params=pltpu.CompilerParams(
            dimension_semantics=("parallel", "parallel"),
            vmem_limit_bytes=48 * 1024 * 1024,
        ),
        cost_estimate=cost,
    )(xp, prepped["wT"], posb, prepped["gamma"], prepped["beta"])
    return out


def dinov2_forward_tokens(x, params, max_rows=2048):
    """Returns (cls_feat (1, E) f32, patch_tokens (B, P, E) bf16).

    The full LN'd sequence is cls_feat (token 0, image independent) followed
    by patch_tokens; they are returned separately so the hot path never pays
    an extra (B, P+1, E) HBM concatenate."""
    prepped = params if "cls_feat" in params else prepare_params(params)
    patch_tokens = _patch_tokens(x, prepped, max_rows=max_rows)
    return prepped["cls_feat"], patch_tokens


def assemble_token_sequence(cls_feat, patch_tokens):
    """Convenience (tests / compat only): dense (B, P+1, E) sequence."""
    B, _, E = patch_tokens.shape
    cls_row = jnp.broadcast_to(cls_feat.astype(patch_tokens.dtype)[None],
                               (B, 1, E))
    return jnp.concatenate([cls_row, patch_tokens], axis=1)


def dinov2_backbone_forward(x, params):
    """Module forward: (B, C, H, W) -> (B, embed_dim).

    The BasicTransformer forward returns token 0 only, i.e.
    LN(cls_token + pos_embed[0]) * gamma + beta, which is independent of the
    image for this fallback architecture.  It is precomputed once in
    prepare_params() and broadcast here (no per-call kernel launch, no dead
    patch GEMM, no full-sequence HBM writeback)."""
    prepped = params if "cls_feat" in params else prepare_params(params)
    B = x.shape[0]
    feat = prepped["cls_feat"]
    return jnp.broadcast_to(feat, (B, feat.shape[1]))


# ---------------------------------------------------------------------------
# Reference + init
# ---------------------------------------------------------------------------

def init_params(key, embed_dim, img_size, patch_size=14, in_ch=3):
    """Deterministic synthetic init mirroring the module's parameter shapes."""
    P = (img_size // patch_size) ** 2
    k1, k2, k3, k4 = jax.random.split(key, 4)
    fan_in = in_ch * patch_size * patch_size
    return {
        "w": jax.random.normal(k1, (embed_dim, in_ch, patch_size, patch_size),
                               jnp.float32) * (1.0 / jnp.sqrt(fan_in)),
        "b": jax.random.normal(k2, (embed_dim,), jnp.float32) * 0.01,
        "cls": jax.random.normal(k3, (1, 1, embed_dim), jnp.float32) * 0.02,
        "pos": jax.random.normal(k4, (1, P + 1, embed_dim), jnp.float32) * 0.02,
        "gamma": jnp.ones((embed_dim,), jnp.float32),
        "beta": jnp.zeros((embed_dim,), jnp.float32),
    }


def reference_tokens(x, params, patch_size=14):
    """Pure-JAX (f32) reference mirroring the PyTorch BasicTransformer."""
    B, C, H, W = x.shape
    Hp, Wp = H // patch_size, W // patch_size
    P = Hp * Wp
    E = params["w"].shape[0]
    K = C * patch_size * patch_size
    xp = x.reshape(B, C, Hp, patch_size, Wp, patch_size)
    xp = xp.transpose(0, 2, 4, 1, 3, 5).reshape(B, P, K)
    emb = xp @ params["w"].reshape(E, K).T + params["b"]              # (B, P, E)
    cls = jnp.broadcast_to(params["cls"], (B, 1, E))
    seq = jnp.concatenate([cls, emb], axis=1) + params["pos"]         # (B, P+1, E)
    mean = jnp.mean(seq, axis=-1, keepdims=True)
    var = jnp.mean((seq - mean) ** 2, axis=-1, keepdims=True)
    seq = (seq - mean) / jnp.sqrt(var + EPS)
    return seq * params["gamma"] + params["beta"]


def reference_forward(x, params, patch_size=14):
    return reference_tokens(x, params, patch_size)[:, 0, :]


# ---------------------------------------------------------------------------
# Main
# ---------------------------------------------------------------------------

if __name__ == "__main__":
    # Small synthetic config ('small' => embed 384), image 112 -> 8x8 = 64
    # patches per image, so the multi-tile path is exercised too.
    EMBED_DIM = 384
    IMG_SIZE = 112
    PATCH = 14
    B, C = 2, 3

    key = jax.random.PRNGKey(0)
    kx, kp = jax.random.split(key)
    x = jax.random.normal(kx, (B, C, IMG_SIZE, IMG_SIZE), jnp.float32)
    params = init_params(kp, EMBED_DIM, IMG_SIZE, PATCH, C)
    prepped = prepare_params(params)

    # 1) Module forward: (B, embed_dim) = LN'd token 0 (image independent for
    #    the BasicTransformer fallback), precomputed + broadcast.
    feats = jax.block_until_ready(dinov2_backbone_forward(x, prepped))
    ref_feats = reference_forward(x, params, PATCH)
    assert feats.shape == (B, EMBED_DIM), feats.shape
    assert jnp.allclose(feats, ref_feats, rtol=1e-4, atol=1e-4), \
        "cls-feature mismatch vs reference"

    # 2) Token path (Pallas kernel), default tiling: one tile per image,
    #    bf16 output, resident pos+bias block.
    ref_seq = reference_tokens(x, params, PATCH)
    cls_feat, patch_tok = dinov2_forward_tokens(x, prepped)
    jax.block_until_ready(patch_tok)
    seq = assemble_token_sequence(cls_feat, patch_tok)
    assert seq.shape == ref_seq.shape, seq.shape
    assert jnp.allclose(seq.astype(jnp.float32), ref_seq,
                        rtol=5e-2, atol=5e-2), \
        "token-sequence mismatch vs reference (default tiling)"

    # 3) Same kernel with a small row budget, exercising the multi-tile path
    #    (resident pos block sliced in-kernel with pl.ds / pl.multiple_of).
    _, patch_tok2 = dinov2_forward_tokens(x, prepped, max_rows=32)
    jax.block_until_ready(patch_tok2)
    assert jnp.allclose(patch_tok2.astype(jnp.float32), ref_seq[:, 1:, :],
                        rtol=5e-2, atol=5e-2), \
        "token-sequence mismatch vs reference (multi-tile path)"

    print("KERNEL_OK")
</pallas_src>

<mosaic_0001>
module attributes {stable_mosaic.version = 11 : i64} {
  func.func @patch_tokens_kernel(%arg0: i32, %arg1: i32, %arg2: memref<1x64x588xbf16, #tpu.memory_space<vmem>>, %arg3: memref<588x384xbf16, #tpu.memory_space<vmem>>, %arg4: memref<64x384xbf16, #tpu.memory_space<vmem>>, %arg5: memref<1x384xf32, #tpu.memory_space<vmem>>, %arg6: memref<1x384xf32, #tpu.memory_space<vmem>>, %arg7: memref<1x64x384xbf16, #tpu.memory_space<vmem>>) attributes {dimension_semantics = [#tpu.dimension_semantics<parallel>, #tpu.dimension_semantics<parallel>], iteration_bounds = array<i64: 2, 1>, scalar_prefetch = 0 : i64, scratch_operands = 0 : i64, tpu.core_type = #tpu.core_type<tc>, window_params = [{transform_indices = @transform_0, window_bounds = array<i64: 1, 64, 588>}, {pipeline_mode = #tpu.pipeline_mode<synchronous>, transform_indices = @transform_1, window_bounds = array<i64: 588, 384>}, {pipeline_mode = #tpu.pipeline_mode<synchronous>, transform_indices = @transform_2, window_bounds = array<i64: 64, 384>}, {pipeline_mode = #tpu.pipeline_mode<synchronous>, transform_indices = @transform_3, window_bounds = array<i64: 1, 384>}, {pipeline_mode = #tpu.pipeline_mode<synchronous>, transform_indices = @transform_4, window_bounds = array<i64: 1, 384>}, {transform_indices = @transform_5, window_bounds = array<i64: 1, 64, 384>}]} {
    %c0 = arith.constant 0 : index
    %c0_0 = arith.constant 0 : index
    %c0_1 = arith.constant 0 : index
    %0 = vector.load %arg2[%c0, %c0_0, %c0_1] : memref<1x64x588xbf16, #tpu.memory_space<vmem>>, vector<1x64x588xbf16>
    %1 = vector.shape_cast %0 : vector<1x64x588xbf16> to vector<64x588xbf16>
    %c0_2 = arith.constant 0 : index
    %c0_3 = arith.constant 0 : index
    %2 = vector.load %arg3[%c0_2, %c0_3] : memref<588x384xbf16, #tpu.memory_space<vmem>>, vector<588x384xbf16>
    %cst = arith.constant dense<0.000000e+00> : vector<64x384xf32>
    %3 = tpu.matmul %1, %2, %cst {dimension_numbers = #tpu.dot_dimension_numbers<[1], [0], [0], [1], [0, 0, 1, 1], [], []>} : vector<64x588xbf16>, vector<588x384xbf16>, vector<64x384xf32> -> vector<64x384xf32>
    %c0_4 = arith.constant 0 : index
    %c0_5 = arith.constant 0 : index
    %4 = vector.load %arg4[%c0_4, %c0_5] : memref<64x384xbf16, #tpu.memory_space<vmem>>, vector<64x384xbf16>
    %5 = arith.extf %4 : vector<64x384xbf16> to vector<64x384xf32>
    %6 = arith.addf %3, %5 : vector<64x384xf32>
    %cst_6 = arith.constant dense<0.000000e+00> : vector<64xf32>
    %7 = vector.multi_reduction <add>, %6, %cst_6 [1] : vector<64x384xf32> to vector<64xf32>
    %8 = vector.shape_cast %7 : vector<64xf32> to vector<64x1xf32>
    %cst_7 = arith.constant 3.840000e+02 : f32
    %9 = vector.broadcast %cst_7 : f32 to vector<64x1xf32>
    %10 = arith.divf %8, %9 : vector<64x1xf32>
    %11 = vector.broadcast %10 : vector<64x1xf32> to vector<64x384xf32>
    %12 = arith.subf %6, %11 : vector<64x384xf32>
    %13 = arith.mulf %12, %12 : vector<64x384xf32>
    %cst_8 = arith.constant dense<0.000000e+00> : vector<64xf32>
    %14 = vector.multi_reduction <add>, %13, %cst_8 [1] : vector<64x384xf32> to vector<64xf32>
    %15 = vector.shape_cast %14 : vector<64xf32> to vector<64x1xf32>
    %cst_9 = arith.constant 3.840000e+02 : f32
    %16 = vector.broadcast %cst_9 : f32 to vector<64x1xf32>
    %17 = arith.divf %15, %16 : vector<64x1xf32>
    %cst_10 = arith.constant 9.99999974E-6 : f32
    %18 = vector.broadcast %cst_10 : f32 to vector<64x1xf32>
    %19 = arith.addf %17, %18 : vector<64x1xf32>
    %20 = math.rsqrt %19 : vector<64x1xf32>
    %21 = vector.broadcast %20 : vector<64x1xf32> to vector<64x384xf32>
    %22 = arith.mulf %12, %21 : vector<64x384xf32>
    %c0_11 = arith.constant 0 : index
    %c0_12 = arith.constant 0 : index
    %23 = vector.load %arg5[%c0_11, %c0_12] : memref<1x384xf32, #tpu.memory_space<vmem>>, vector<1x384xf32>
    %24 = vector.broadcast %23 : vector<1x384xf32> to vector<64x384xf32>
    %25 = arith.mulf %22, %24 : vector<64x384xf32>
    %c0_13 = arith.constant 0 : index
    %c0_14 = arith.constant 0 : index
    %26 = vector.load %arg6[%c0_13, %c0_14] : memref<1x384xf32, #tpu.memory_space<vmem>>, vector<1x384xf32>
    %27 = vector.broadcast %26 : vector<1x384xf32> to vector<64x384xf32>
    %28 = arith.addf %25, %27 : vector<64x384xf32>
    %29 = arith.truncf %28 : vector<64x384xf32> to vector<64x384xbf16>
    %c0_15 = arith.constant 0 : index
    %c0_16 = arith.constant 0 : index
    %c0_17 = arith.constant 0 : index
    %30 = vector.load %arg7[%c0_15, %c0_16, %c0_17] : memref<1x64x384xbf16, #tpu.memory_space<vmem>>, vector<1x64x384xbf16>
    %31 = vector.shape_cast %30 : vector<1x64x384xbf16> to vector<64x384xbf16>
    %32 = vector.shape_cast %29 : vector<64x384xbf16> to vector<1x64x384xbf16>
    tpu.vector_store %arg7[%c0_15, %c0_16, %c0_17], %32 {strides = array<i32>} : memref<1x64x384xbf16, #tpu.memory_space<vmem>>, vector<1x64x384xbf16>,
    return
  }
  func.func @transform_0(%arg0: i32, %arg1: i32) -> (i32, i32, i32) {
    %c0_i32 = arith.constant 0 : i32
    %c0_i32_0 = arith.constant 0 : i32
    return %arg0, %arg1, %c0_i32 : i32, i32, i32
  }
  func.func @transform_1(%arg0: i32, %arg1: i32) -> (i32, i32) {
    %c0_i32 = arith.constant 0 : i32
    %c0_i32_0 = arith.constant 0 : i32
    %c0_i32_1 = arith.constant 0 : i32
    return %c0_i32, %c0_i32_0 : i32, i32
  }
  func.func @transform_2(%arg0: i32, %arg1: i32) -> (i32, i32) {
    %c0_i32 = arith.constant 0 : i32
    %c0_i32_0 = arith.constant 0 : i32
    %c0_i32_1 = arith.constant 0 : i32
    return %c0_i32, %c0_i32_0 : i32, i32
  }
  func.func @transform_3(%arg0: i32, %arg1: i32) -> (i32, i32) {
    %c0_i32 = arith.constant 0 : i32
    %c0_i32_0 = arith.constant 0 : i32
    %c0_i32_1 = arith.constant 0 : i32
    return %c0_i32, %c0_i32_0 : i32, i32
  }
  func.func @transform_4(%arg0: i32, %arg1: i32) -> (i32, i32) {
    %c0_i32 = arith.constant 0 : i32
    %c0_i32_0 = arith.constant 0 : i32
    %c0_i32_1 = arith.constant 0 : i32
    return %c0_i32, %c0_i32_0 : i32, i32
  }
  func.func @transform_5(%arg0: i32, %arg1: i32) -> (i32, i32, i32) {
    %c0_i32 = arith.constant 0 : i32
    %c0_i32_0 = arith.constant 0 : i32
    return %arg0, %arg1, %c0_i32 : i32, i32, i32
  }
}

</mosaic_0001>

<bundles_post_ra>
// kernel: tpu_custom_call.1
= control target key start
LH: loop header
LB: loop body
LE: loop exit
PB: predicated region body
PF: predicated region fallthrough
CT: control target
= control target key end

     0   :  { %s3670_s0 = inlined_call_operand.hbm [shape: bf16[2,64,588], index: 0, kind: input, shape index: {}]   ;;  %s3671_s1 = inlined_call_operand.hbm [shape: bf16[588,384], index: 1, kind: input, shape index: {}]   ;;  %s3672_s2 = inlined_call_operand.hbm [shape: bf16[64,384], index: 2, kind: input, shape index: {}]   ;;  %s3673_s3 = inlined_call_operand.vmem [shape: f32[1,384], index: 3, kind: input, shape index: {}]   ;;  %s3674_s4 = inlined_call_operand.vmem [shape: f32[1,384], index: 4, kind: input, shape index: {}]   ;;  %s3675_s5 = inlined_call_operand.hbm [shape: bf16[2,64,384], index: 5, kind: output, shape index: {}]  }
   0x1   :  { %3679 = sst [smem:[#allocation31_spill]] %s3671_s1 }
   0x2   :  { %3680 = sst [smem:[#allocation32_spill]] %s3672_s2 }
   0x3   :  { %10 = vsyncpa [#allocation3], 0 }
   0x4   :  { %12 = vsyncpa [#allocation3 + $0x1], 0 }
   0x5   :  { %13 = vsyncpa [#allocation6], 0 }
   0x6   :  { %14 = vsyncpa [#allocation4], 0 }
   0x7   :  { %16 = vsyncpa [#allocation4 + $0x1], 0  ;;  %s2889_s18 = smov 0   ;;  %s2891_s19 = smov 0  }
   0x8   :  { %s2893_s20 = smov 0   ;;  %s2895_s21 = smov 0  }
   0x9   :  { %s2897_s22 = smov 0   ;;  %s2899_s23 = smov 0  }
   0xa LB: > { %s2102_s24 = sadd.s32 4294967295, %s2846_s23   ;;  %s2103_s25 = sadd.s32 4294967294, %s2846_s23   ;;  %s2846_s23 = sphi %s2899_s23, %s22_s23   ;;  %s2842_s22 = sphi %s2897_s22, %s3737_s22   ;;  %s2838_s21 = sphi %s2895_s21, %s3736_s21   ;;  %s2834_s20 = sphi %s2893_s20, %s3735_s20   ;;  %s2830_s19 = sphi %s2891_s19, %s3734_s19   ;;  %s2826_s18 = sphi %s2889_s18, %s3733_s18  }
   0xb   : > { %p56_p0 = scmp.ne.s32.totalorder %s2830_s19, %s2826_s18  ;;  %p2923_p1 = scmp.eq.s32.totalorder %s2102_s24, 0 }
   0xc   : > { %p2927_p2 = scmp.eq.s32.totalorder %s2102_s24, 1  ;;  %p172_p3 = scmp.eq.s32.totalorder %s2103_s25, 1 }
   0xd   : > { %s3681_s26 = scalar_select %p2923_p1, 1, 0 }
   0xe   : > { %p2933_p4 = por %p2923_p1, %p56_p0  ;;  %p2104_p5 = scmp.ge.s32.totalorder %s2846_s23, 1 }
   0xf   : > { %p2938_p6 = por %p172_p3, %p56_p0  ;;  %p179_p7 = scmp.lt.s32.totalorder %s2846_s23, 3 }
  0x10   : > { %s3683_s28 = scalar_select %p2933_p4, 1, 0 }
  0x11   : > { %s3684_s29 = scalar_select %p2938_p6, 1, 0 }
  0x12   : > { %p2943_p8 = pnand %p2104_p5, %p179_p7  ;;  %s2848_s6 = smov [#allocation5]  }
  0x13   : > { %s191_s7 = sshll.u32 %s2848_s6, 4  ;;  %s2849_s9 = smov [#allocation7]   ;;  %s192_s7 = int_to_ptr.vmem [resolvable:$true] %s191_s7 }
  0x14   : > { %p2412_p9 = pneg %p2943_p8  ;;  %s204_s10 = sshll.u32 %s2849_s9, 4  ;;  %s205_s10 = int_to_ptr.vmem [resolvable:$true] %s204_s10 }
  0x15   : > { %s2693_s11 = scalar_lea.vmem %s192_s7, 14208  ;;  %p2701_p5 = scmp.lt.s32.totalorder %s192_s7, %s192_s7 }
  0x16   : > { %p2952_p11 = pnand %p2412_p9, %p2923_p1  ;;  %p2694_p13 = scmp.ne.s32.totalorder %s192_s7, %s2693_s11 }
  0x17   : > { %p2702_p7 = scmp.lt.s32.totalorder %s2693_s11, %s2693_s11 }
  0x18   : > { %p2684_p12 = pneg %p2952_p11 }
  0x19   : > { %p2703_p10 = por %p2702_p7, %p2701_p5 }
  0x1a   : > { %p2696_p0 = pnand %p2694_p13, %p2684_p12 }
  0x1c   : > { %p2697_p3 = pneg %p2696_p0 }
  0x1e   : > { %p2704_p9 = pnand %p2703_p10, %p2697_p3 }
  0x20   : > { %2707 = shalt.err (!%p2704_p9)
}
  0x21   : > { %s2850_s12 = smov 192   ;;  %s2851_s13 = smov 12  }
  0x22   : > { %s3687_s1 = sld [smem:[#allocation31_spill]]  ;;  %s2719_s16 = scalar_lea.vmem %s205_s10, 1536 }
  0x23   : > { %p2720_p6 = scmp.ne.s32.totalorder %s205_s10, %s2719_s16  ;;  %p2727_p1 = scmp.lt.s32.totalorder %s205_s10, %s205_s10 }
  0x24   : > { %p2728_p4 = scmp.lt.s32.totalorder %s2719_s16, %s2719_s16 }
  0x25   : > { %p2722_p13 = pnand %p2720_p6, %p2684_p12 }
  0x26   : > { %p2729_p5 = por %p2728_p4, %p2727_p1 }
  0x27   : > { %p2723_p0 = pneg %p2722_p13 }
  0x28   : > { %2415 = dma.hbm_to_vmem [thread:$0]  (!%p2952_p11), %s3687_s1, 14208, %s192_s7, [#allocation6], %s2850_s12, %s2850_s12, %s2851_s13  }
  0x29   : > { %p2730_p10 = pnand %p2729_p5, %p2723_p0 }
  0x2b   : > { %2733 = shalt.err (!%p2730_p10)
}
  0x2c   : > { %s3688_s2 = sld [smem:[#allocation32_spill]]  ;;  %s34_s25 = sadd.s32 1, %s2842_s22 }
  0x2d   : > { %s43_s6 = sadd.s32 1, %s2834_s20  ;;  %p36_p1 = scmp.ge.s32.totalorder %s34_s25, 2 }
  0x2e   : > { %p50_p4 = scmp.ne.s32.totalorder %s2834_s20, %s2830_s19  ;;  %p51_p6 = scmp.eq.s32.totalorder %s2846_s23, 0 }
  0x2f   : > { %p2429_p12 = scmp.lt.s32.totalorder %s2846_s23, 2  ;;  %s3739_s25 = smov (%p36_p1, %s34_s25), 0 }
  0x30   : > { %p52_p3 = por %p51_p6, %p50_p4  ;;  %p2984_p7 = por %p2927_p2, %p50_p4 }
  0x31   : > { %s38_s8 = ssub.s32 %s2842_s22, %s3739_s25  ;;  %s224_s9 = sand.u32 1, %s2834_s20  }
  0x32   : > { %2418 = dma.hbm_to_vmem [thread:$0]  (!%p2952_p11), %s3688_s2, 1536, %s205_s10, [#allocation6], %s2850_s12, %s2850_s12, %s2851_s13  }
  0x33   : > { %p41_p9 = scmp.eq.s32.totalorder %s38_s8, 0  ;;  %s2395_s10 = smul.u32 160, %s224_s9 }
  0x34   : > { %p2991_p11 = pnand %p2429_p12, %p52_p3  ;;  %s2396_s13 = smul.u32 2560, %s2842_s22 }
  0x35   : > { %s2996_s12 = scalar_select %p41_p9, %s2834_s20, %s43_s6  }
  0x36   : > { %s228_s14 = scalar_lea.vmem [#allocation2], %s2395_s10  ;;  %s237_s17 = scalar_lea.hbm %s3670_s0, %s2396_s13 }
  0x37   : > { %s238_s15 = sshll.u32 %s228_s14, 4  ;;  %s225_s24 = scalar_lea.sflag [#allocation3], %s224_s9  ;;  %s239_s15 = int_to_ptr.vmem [resolvable:$true] %s238_s15 }
  0x38   : > { %p2736_p2 = pneg %p2991_p11  ;;  %s2747_s8 = scalar_lea.vmem %s239_s15, 2560 }
  0x39   : > { %p2748_p13 = scmp.ne.s32.totalorder %s239_s15, %s2747_s8  ;;  %s2852_s1 = smov [#allocation2]  }
  0x3a   : > { %s2752_s2 = sshll.u32 %s2852_s1, 4  ;;  %s2753_s2 = int_to_ptr.vmem [resolvable:$false] %s2752_s2 }
  0x3b   : > { %p2750_p0 = pnand %p2748_p13, %p2736_p2  ;;  %s2754_s6 = scalar_lea.vmem %s2753_s2, 5120 }
  0x3c   : > { %p2755_p10 = scmp.lt.s32.totalorder %s239_s15, %s2753_s2  ;;  %p2756_p1 = scmp.lt.s32.totalorder %s2754_s6, %s2747_s8 }
  0x3d   : > { %p2751_p5 = pneg %p2750_p0 }
  0x3e   : > { %p2757_p4 = por %p2756_p1, %p2755_p10 }
  0x40   : > { %p2758_p6 = pnand %p2757_p4, %p2751_p5 }
  0x42   : > { %2761 = shalt.err (!%p2758_p6)
}
  0x43   : > { %s2853_s10 = smov 320   ;;  %s2854_s13 = smov 20  }
  0x44   : > { %2422 = dma.hbm_to_vmem [thread:$0]  (!%p2991_p11), %s237_s17, 2560, %s239_s15, %s225_s24, %s2853_s10, %s2853_s10, %s2854_s13  }
  0x45   : > { %250 = sbr.rel (%p2943_p8) target bundleno = 769 (0x301), region = 40 }
  0x4a   : > { %s3009_s9 = sand.u32 1, %s2830_s19   ;;  %p3691_p12 = scmp.ne.s32.totalorder %s3683_s28, 0 }
  0x4b   : > { %s2397_s1 = smul.u32 160, %s3009_s9  ;;  %s253_s2 = scalar_lea.sflag [#allocation3], %s3009_s9 }
  0x4d   : > { %s3013_s14 = scalar_lea.vmem [#allocation2], %s2397_s1 }
  0x4e   : > { %2813 = dma.done.wait (%p3691_p12), %s253_s2, 2560  }
  0x4f   : > { %2815 = vsyncadd (%p3691_p12), %s253_s2, 4294964736  ;;  %p3692_p3 = scmp.ne.s32.totalorder %s3681_s26, 0 }
  0x51   : > { %2817 = dma.done.wait (%p3692_p3), [#allocation6], 15744  }
  0x52   : > { %2819 = vsyncadd (%p3692_p3), [#allocation6], 4294951552  ;;  %v2490_v0 = vld [vmem:[#allocation5 + $0xac] ss:$12 sps:$4 sm:$0xff]   ;;  %v2492_v1 = vld [vmem:[#allocation5 + $0xa8] ss:$12 sps:$4 sm:$0xff]  }
  0x53   : > { %1218 = vmatprep.subr.bf16.mxu0 %v2490_v0  ;;  %v2493_v2 = vld [vmem:[#allocation5 + $0x22c] ss:$12 sps:$4 sm:$0xff]   ;;  %v2495_v3 = vld [vmem:[#allocation5 + $0x228] ss:$12 sps:$4 sm:$0xff]   ;;  %v2498_v5 = vld [vmem:[#allocation5 + $0x90] ss:$12 sps:$4 sm:$0xff]  }
  0x54   : > { %1219 = vmatpush1.bf16.msra.mxu0 %v2492_v1  ;;  %v2496_v4 = vld [vmem:[#allocation5 + $0x94] ss:$12 sps:$4 sm:$0xff]   ;;  %1291 = vmatprep.subr.bf16.mxu1 %v2493_v2  ;;  %v2501_v7 = vld [vmem:[#allocation5 + $0x210] ss:$12 sps:$4 sm:$0xff]   ;;  %v2504_v9 = vld [vmem:[#allocation5 + $0x78] ss:$12 sps:$4 sm:$0xff]  }
  0x55   : > { %v2499_v6 = vld [vmem:[#allocation5 + $0x214] ss:$12 sps:$4 sm:$0xff]   ;;  %1292 = vmatpush1.bf16.msra.mxu1 %v2495_v3  ;;  %1220 = vmatprep.subr.bf16.mxu0 %v2496_v4  ;;  %v2502_v8 = vld [vmem:[#allocation5 + $0x7c] ss:$12 sps:$4 sm:$0xff]   ;;  %v2508_v11 = vld [vmem:[#allocation5 + $0x64] ss:$12 sps:$4 sm:$0xff]  }
  0x56   : > { %1293 = vmatprep.subr.bf16.mxu1 %v2499_v6  ;;  %v2505_v10 = vld [vmem:[#allocation5 + $0x1fc] ss:$12 sps:$4 sm:$0xff]   ;;  %v2507_v12 = vld [vmem:[#allocation5 + $0x1f8] ss:$12 sps:$4 sm:$0xff]   ;;  %v2510_v14 = vld [vmem:[#allocation5 + $0x60] ss:$12 sps:$4 sm:$0xff]  }
  0x57   : > { %v2511_v13 = vld [vmem:[#allocation5 + $0x1e4] ss:$12 sps:$4 sm:$0xff]   ;;  %v2514_v15 = vld [vmem:[#allocation5 + $0x4c] ss:$12 sps:$4 sm:$0xff]   ;;  %v2516_v18 = vld [vmem:[#allocation5 + $0x48] ss:$12 sps:$4 sm:$0xff]  }
  0x58   : > { %1221 = vmatpush1.bf16.msra.mxu0 %v2498_v5  ;;  %v2513_v16 = vld [vmem:[#allocation5 + $0x1e0] ss:$12 sps:$4 sm:$0xff]   ;;  %v2519_v20 = vld [vmem:[#allocation5 + $0x1c8] ss:$12 sps:$4 sm:$0xff]   ;;  %v2522_v22 = vld [vmem:[#allocation5 + $0x30] ss:$12 sps:$4 sm:$0xff]  }
  0x59   : > { %1222 = vmatprep.subr.bf16.mxu0 %v2502_v8  ;;  %1294 = vmatpush1.bf16.msra.mxu1 %v2501_v7  ;;  %v2517_v17 = vld [vmem:[#allocation5 + $0x1cc] ss:$12 sps:$4 sm:$0xff]   ;;  %v2520_v19 = vld [vmem:[#allocation5 + $0x34] ss:$12 sps:$4 sm:$0xff]   ;;  %v2526_v23 = vld [vmem:[#allocation5 + $0x1c] ss:$12 sps:$4 sm:$0xff]  }
  0x5a   : > { %1295 = vmatprep.subr.bf16.mxu1 %v2505_v10  ;;  %v2523_v21 = vld [vmem:[#allocation5 + $0x1b4] ss:$12 sps:$4 sm:$0xff]   ;;  %v2525_v24 = vld [vmem:[#allocation5 + $0x1b0] ss:$12 sps:$4 sm:$0xff]   ;;  %v2528_v26 = vld [vmem:[#allocation5 + $0x18] ss:$12 sps:$4 sm:$0xff]  }
  0x5b   : > { %v2529_v25 = vld [vmem:[#allocation5 + $0x19c] ss:$12 sps:$4 sm:$0xff]   ;;  %v2532_v27 = vld [vmem:[#allocation5 + $0x4] ss:$12 sps:$4 sm:$0xff]   ;;  %v2534_v30 = vld [vmem:[#allocation5] ss:$12 sps:$4 sm:$0xff]  }
  0x5c   : > { %1223 = vmatpush1.bf16.msra.mxu0 %v2504_v9  ;;  %v2531_v28 = vld [vmem:[#allocation5 + $0x198] ss:$12 sps:$4 sm:$0xff]   ;;  %v2537_v32 = vld [vmem:[#allocation5 + $0x180] ss:$12 sps:$4 sm:$0xff]   ;;  %v2540_v34 = vld [vmem:[#allocation5 + $0x168] ss:$12 sps:$4 sm:$0xff]  }
  0x5d   : > { %1224 = vmatprep.subr.bf16.mxu0 %v2508_v11  ;;  %1296 = vmatpush1.bf16.msra.mxu1 %v2507_v12  ;;  %v2535_v29 = vld [vmem:[#allocation5 + $0x184] ss:$12 sps:$4 sm:$0xff]   ;;  %v2538_v31 = vld [vmem:[#allocation5 + $0x16c] ss:$12 sps:$4 sm:$0xff]   ;;  %v2544_v35 = vld [vmem:[#allocation5 + $0x154] ss:$12 sps:$4 sm:$0xff]  }
  0x5e   : > { %1297 = vmatprep.subr.bf16.mxu1 %v2511_v13  ;;  %v2541_v33 = vld [vmem:[#allocation5 + $0x2ec] ss:$12 sps:$4 sm:$0xff]   ;;  %v2543_v36 = vld [vmem:[#allocation5 + $0x2e8] ss:$12 sps:$4 sm:$0xff]   ;;  %v2546_v38 = vld [vmem:[#allocation5 + $0x150] ss:$12 sps:$4 sm:$0xff]  }
  0x5f   : > { %v2547_v37 = vld [vmem:[#allocation5 + $0x2d4] ss:$12 sps:$4 sm:$0xff]   ;;  %v2550_v39 = vld [vmem:[#allocation5 + $0x13c] ss:$12 sps:$4 sm:$0xff]   ;;  %v2552_v42 = vld [vmem:[#allocation5 + $0x138] ss:$12 sps:$4 sm:$0xff]  }
  0x60   : > { %1225 = vmatpush1.bf16.msra.mxu0 %v2510_v14  ;;  %v2549_v40 = vld [vmem:[#allocation5 + $0x2d0] ss:$12 sps:$4 sm:$0xff]   ;;  %v2555_v44 = vld [vmem:[#allocation5 + $0x2b8] ss:$12 sps:$4 sm:$0xff]   ;;  %v2558_v46 = vld [vmem:[#allocation5 + $0x120] ss:$12 sps:$4 sm:$0xff]  }
  0x61   : > { %1226 = vmatprep.subr.bf16.mxu0 %v2514_v15  ;;  %1298 = vmatpush1.bf16.msra.mxu1 %v2513_v16  ;;  %v2553_v41 = vld [vmem:[#allocation5 + $0x2bc] ss:$12 sps:$4 sm:$0xff]   ;;  %v2556_v43 = vld [vmem:[#allocation5 + $0x124] ss:$12 sps:$4 sm:$0xff]   ;;  %v2561_v47 = vld [vmem:[#allocation5 + $0x2a0] ss:$12 sps:$4 sm:$0xff]  }
  0x62   : > { %1299 = vmatprep.subr.bf16.mxu1 %v2517_v17  ;;  %v2559_v45 = vld [vmem:[#allocation5 + $0x2a4] ss:$12 sps:$4 sm:$0xff]   ;;  %v2562_v49 = vld [vmem:[#allocation5 + $0x10c] ss:$12 sps:$4 sm:$0xff]   ;;  %v2564_v50 = vld [vmem:[#allocation5 + $0x108] ss:$12 sps:$4 sm:$0xff]  }
  0x63   : > { %v3024_v48 = vld [vmem:[%s3013_s14 + $0x4] ss:$20 sps:$4 sm:$0xff]   ;;  %v3028_v52 = vld [vmem:[%s3013_s14 + $0xc] ss:$20 sps:$4 sm:$0xff]   ;;  %v2567_v54 = vld [vmem:[#allocation5 + $0x288] ss:$12 sps:$4 sm:$0xff]  }
  0x64   : > { %1227 = vmatpush1.bf16.msra.mxu0 %v2516_v18  ;;  %1250 = vmatprep.mubr.bf16.mxu0 %v3024_v48  ;;  %v2565_v51 = vld [vmem:[#allocation5 + $0x28c] ss:$12 sps:$4 sm:$0xff]   ;;  %v2568_v53 = vld [vmem:[#allocation5 + $0xf4] ss:$12 sps:$4 sm:$0xff]   ;;  %v2570_v56 = vld [vmem:[#allocation5 + $0xf0] ss:$12 sps:$4 sm:$0xff]  }
  0x65   : > { %1228 = vmatprep.subr.bf16.mxu0 %v2520_v19  ;;  %1300 = vmatpush1.bf16.msra.mxu1 %v2519_v20  ;;  %v2571_v55 = vld [vmem:[#allocation5 + $0x274] ss:$12 sps:$4 sm:$0xff]   ;;  %v2574_v57 = vld [vmem:[#allocation5 + $0xdc] ss:$12 sps:$4 sm:$0xff]   ;;  %v2576_v60 = vld [vmem:[#allocation5 + $0xd8] ss:$12 sps:$4 sm:$0xff]  }
  0x66   : > { %1301 = vmatprep.subr.bf16.mxu1 %v2523_v21  ;;  %1323 = vmatprep.mubr.bf16.mxu1 %v3028_v52  ;;  %v2573_v58 = vld [vmem:[#allocation5 + $0x270] ss:$12 sps:$4 sm:$0xff]   ;;  %v2579_v61 = vld [vmem:[#allocation5 + $0x258] ss:$12 sps:$4 sm:$0xff]   ;;  %v2582_v1 = vld [vmem:[#allocation5 + $0xc0] ss:$12 sps:$4 sm:$0xff]  }
  0x67   : > { %v2577_v59 = vld [vmem:[#allocation5 + $0x25c] ss:$12 sps:$4 sm:$0xff]   ;;  %v2580_v62 = vld [vmem:[#allocation5 + $0xc4] ss:$12 sps:$4 sm:$0xff]   ;;  %v3032_v2 = vld [vmem:[%s3013_s14] ss:$20 sps:$4 sm:$0xff]  }
  0x68   : > { %1229 = vmatpush1.bf16.msra.mxu0 %v2522_v22  ;;  %v2583_v63 = vld [vmem:[#allocation5 + $0x244] ss:$12 sps:$4 sm:$0xff]   ;;  %v2594_v0 = vld [vmem:[#allocation5 + $0x360] ss:$12 sps:$4 sm:$0x3f]   ;;  %vm1208_vm0 = vcmask 1045504  }
  0x69   : > { %1230 = vmatprep.subr.bf16.mxu0 %v2526_v23  ;;  %1302 = vmatpush1.bf16.msra.mxu1 %v2525_v24  ;;  %v2589_v3 = vld [vmem:[#allocation5 + $0x364] ss:$12 sps:$4 sm:$0x3f]   ;;  %v2588_v4 = vld [vmem:[#allocation5 + $0x240] ss:$12 sps:$4 sm:$0xff]   ;;  %v1210_v7 = vsel %vm1208_vm0, %v2594_v0, 0 }
  0x6a   : > { %1303 = vmatprep.subr.bf16.mxu1 %v2529_v25  ;;  %v3035_v5 = vld [vmem:[%s3013_s14 + $0x8] ss:$20 sps:$4 sm:$0xff]   ;;  %v3039_v9 = vld [vmem:[%s3013_s14 + $0x2c] ss:$20 sps:$4 sm:$0xff]   ;;  %v2603_v12 = vld [vmem:[#allocation5 + $0x158] ss:$12 sps:$4 sm:$0xff]  }
  0x6b   : > { %v2595_v6 = vld [vmem:[#allocation5 + $0x170] ss:$12 sps:$4 sm:$0xff]   ;;  %v2601_v10 = vld [vmem:[#allocation5 + $0x34c] ss:$12 sps:$4 sm:$0xff]   ;;  %v3043_v11 = vld [vmem:[%s3013_s14 + $0x34] ss:$20 sps:$4 sm:$0xff]  }
  0x6c   : > { %1231 = vmatpush1.bf16.msra.mxu0 %v2528_v26  ;;  %v2596_v8 = vld [vmem:[#allocation5 + $0xb0] ss:$12 sps:$4 sm:$0xff]   ;;  %v2599_v13 = vld [vmem:[#allocation5 + $0x348] ss:$12 sps:$4 sm:$0xff]   ;;  %v2606_v16 = vld [vmem:[#allocation5 + $0x98] ss:$12 sps:$4 sm:$0xff]  }
  0x6d   : > { %1232 = vmatprep.subr.bf16.mxu0 %v2532_v27  ;;  %1304 = vmatpush1.bf16.msra.mxu1 %v2531_v28  ;;  %v3049_v14 = vld [vmem:[%s3013_s14 + $0x28] ss:$20 sps:$4 sm:$0xff]   ;;  %v2611_v15 = vld [vmem:[#allocation5 + $0x334] ss:$12 sps:$4 sm:$0xff]   ;;  %v3053_v17 = vld [vmem:[%s3013_s14 + $0x30] ss:$20 sps:$4 sm:$0xff]  }
  0x6e   : > { %1305 = vmatprep.subr.bf16.mxu1 %v2535_v29  ;;  %v2608_v18 = vld [vmem:[#allocation5 + $0x140] ss:$12 sps:$4 sm:$0xff]   ;;  %v2609_v19 = vld [vmem:[#allocation5 + $0x330] ss:$12 sps:$4 sm:$0xff]   ;;  %v3056_v21 = vld [vmem:[%s3013_s14 + $0x54] ss:$20 sps:$4 sm:$0xff]  }
  0x6f   : > { %v2612_v20 = vld [vmem:[#allocation5 + $0x80] ss:$12 sps:$4 sm:$0xff]   ;;  %v2623_v22 = vld [vmem:[#allocation5 + $0x31c] ss:$12 sps:$4 sm:$0xff]   ;;  %v2621_v26 = vld [vmem:[#allocation5 + $0x318] ss:$12 sps:$4 sm:$0xff]  }
  0x70   : > { %1233 = vmatpush1.bf16.msra.mxu0 %v2534_v30  ;;  %v3059_v23 = vld [vmem:[%s3013_s14 + $0x5c] ss:$20 sps:$4 sm:$0xff]   ;;  %v2616_v24 = vld [vmem:[#allocation5 + $0x128] ss:$12 sps:$4 sm:$0xff]   ;;  %v3069_v30 = vld [vmem:[%s3013_s14 + $0x58] ss:$20 sps:$4 sm:$0xff]  }
  0x71   : > { %1234 = vmatprep.subr.bf16.mxu0 %v2538_v31  ;;  %1306 = vmatpush1.bf16.msra.mxu1 %v2537_v32  ;;  %v2619_v25 = vld [vmem:[#allocation5 + $0x68] ss:$12 sps:$4 sm:$0xff]   ;;  %v3065_v27 = vld [vmem:[%s3013_s14 + $0x50] ss:$20 sps:$4 sm:$0xff]   ;;  %vm1195_vm1 = vcmask 621568   ;;  %s2398_s15 = smul.u32 96, %s3009_s9 }
  0x72   : > { %1307 = vmatprep.subr.bf16.mxu1 %v2541_v33  ;;  %v2636_v28 = vld [vmem:[#allocation5 + $0x304] ss:$12 sps:$4 sm:$0xff]   ;;  %v2634_v33 = vld [vmem:[#allocation5 + $0x300] ss:$12 sps:$4 sm:$0xff]   ;;  %s2399_s27 = smul.u32 1536, %s2838_s21  ;;  %s1980_s6 = scalar_lea.sflag [#allocation4], %s3009_s9 }
  0x73   : > { %v2624_v29 = vld [vmem:[#allocation5 + $0x110] ss:$12 sps:$4 sm:$0xff]   ;;  %v2655_v0 = vld [vmem:[#allocation5 + $0x278] ss:$12 sps:$4 sm:$0xff]   ;;  %s3540_s16 = scalar_lea.vmem [#allocation8], %s2398_s15  ;;  %s2856_s13 = smov [#allocation8]  }
  0x74   : > { %1235 = vmatpush2.bf16.msra.mxu0 %v2540_v34  ;;  %v3072_v31 = vld [vmem:[%s3013_s14 + $0x7c] ss:$20 sps:$4 sm:$0xff]   ;;  %s1996_s17 = sshll.u32 %s3540_s16, 4  ;;  %s3618_s8 = scalar_lea.hbm %s3675_s5, %s2399_s27  ;;  %s3620_s17 = int_to_ptr.vmem [resolvable:$true] %s1996_s17 }
  0x75   : > { %1236 = vmatprep.subr.bf16.mxu0 %v2544_v35  ;;  %1308 = vmatpush2.bf16.msra.mxu1 %v2543_v36  ;;  %v2625_v32 = vld [vmem:[#allocation5 + $0x50] ss:$12 sps:$4 sm:$0xff]   ;;  %v3075_v35 = vld [vmem:[%s3013_s14 + $0x84] ss:$20 sps:$4 sm:$0xff]   ;;  %s2762_s10 = scalar_lea.vmem %s3620_s17, 1536  ;;  %s2766_s1 = sshll.u32 %s2856_s13, 4  ;;  %s2767_s1 = int_to_ptr.vmem [resolvable:$false] %s2766_s1 }
  0x76   : > { %1309 = vmatprep.subr.bf16.mxu1 %v2547_v37  ;;  %v2641_v34 = vld [vmem:[#allocation5 + $0x2f0] ss:$12 sps:$4 sm:$0xff]   ;;  %v2629_v36 = vld [vmem:[#allocation5 + $0xf8] ss:$12 sps:$4 sm:$0xff]   ;;  %p2763_p8 = scmp.ne.s32.totalorder %s3620_s17, %s2762_s10  ;;  %s2768_s2 = scalar_lea.vmem %s2767_s1, 3072 }
  0x77   : > { %v3081_v37 = vld [vmem:[%s3013_s14 + $0x78] ss:$20 sps:$4 sm:$0xff]   ;;  %p2769_p2 = scmp.lt.s32.totalorder %s3620_s17, %s2767_s1  ;;  %p2770_p13 = scmp.lt.s32.totalorder %s2768_s2, %s2762_s10 }
  0x78   : > { %1237 = vmatpush2.bf16.msra.mxu0 %v2546_v38  ;;  %v2632_v38 = vld [vmem:[#allocation5 + $0x38] ss:$12 sps:$4 sm:$0xff]   ;;  %p2764_p9 = pnand %p2763_p8, %p2984_p7 }
  0x79   : > { %1238 = vmatprep.subr.bf16.mxu0 %v2550_v39  ;;  %1310 = vmatpush2.bf16.msra.mxu1 %v2549_v40  ;;  %v2637_v39 = vld [vmem:[#allocation5 + $0xe0] ss:$12 sps:$4 sm:$0xff]   ;;  %p2771_p0 = por %p2770_p13, %p2769_p2 }
  0x7a   : > { %1311 = vmatprep.subr.bf16.mxu1 %v2553_v41  ;;  %v3085_v40 = vld [vmem:[%s3013_s14 + $0x80] ss:$20 sps:$4 sm:$0xff]   ;;  %p2765_p11 = pneg %p2764_p9 }
  0x7b   : > { %v2638_v41 = vld [vmem:[#allocation5 + $0x20] ss:$12 sps:$4 sm:$0xff]  }
  0x7c   : > { %1239 = vmatpush2.bf16.msra.mxu0 %v2552_v42  ;;  %v2640_v42 = vld [vmem:[#allocation5 + $0xc8] ss:$12 sps:$4 sm:$0xff]   ;;  %p2772_p5 = pnand %p2771_p0, %p2765_p11 }
  0x7d   : > { %1240 = vmatprep.subr.bf16.mxu0 %v2556_v43  ;;  %1312 = vmatpush2.bf16.msra.mxu1 %v2555_v44  ;;  %v2855_v43 = vmov 0   ;;  %v2653_v44 = vld [vmem:[#allocation5 + $0x368] ss:$12 sps:$4 sm:$0x3f]  }
  0x7e   : > { %1313 = vmatprep.subr.bf16.mxu1 %v2559_v45  ;;  %v2642_v45 = vld [vmem:[#allocation5 + $0x8] ss:$12 sps:$4 sm:$0xff]  }
  0x80   : > { %1241 = vmatpush2.bf16.msra.mxu0 %v2558_v46  ;;  %v3091_v46 = vld [vmem:[%s3013_s14 + $0x10] ss:$20 sps:$4 sm:$0xff]  }
  0x81   : > { %1242 = vmatprep.subr.bf16.mxu0 %v2562_v49  ;;  %1314 = vmatpush2.bf16.msra.mxu1 %v2561_v47  ;;  %v2643_v47 = vld [vmem:[#allocation5 + $0x230] ss:$12 sps:$4 sm:$0xff]   ;;  %v2644_v49 = vld [vmem:[#allocation5 + $0x2d8] ss:$12 sps:$4 sm:$0xff]  }
  0x82   : > { %1315 = vmatprep.subr.bf16.mxu1 %v2565_v51  ;;  %v2656_v51 = vld [vmem:[#allocation5 + $0x350] ss:$12 sps:$4 sm:$0xff]  }
  0x84   : > { %1243 = vmatpush2.bf16.msra.mxu0 %v2564_v50  ;;  %v1216_v50 = vsel %vm1208_vm0, %v2653_v44, 0 }
  0x85   : > { %1244 = vmatprep.subr.bf16.mxu0 %v2568_v53  ;;  %1316 = vmatpush2.bf16.msra.mxu1 %v2567_v54  ;;  %v2645_v53 = vld [vmem:[#allocation5 + $0x218] ss:$12 sps:$4 sm:$0xff]  }
  0x86   : > { %1317 = vmatprep.subr.bf16.mxu1 %v2571_v55  ;;  %v2646_v54 = vld [vmem:[%s3013_s14 + $0x38] ss:$20 sps:$4 sm:$0xff]  }
  0x87   : > { %v2660_v55 = vld [vmem:[#allocation5 + $0x338] ss:$12 sps:$4 sm:$0xff]  }
  0x88   : > { %1245 = vmatpush2.bf16.msra.mxu0 %v2570_v56  ;;  %v2648_v56 = vld [vmem:[#allocation5 + $0x200] ss:$12 sps:$4 sm:$0xff]  }
  0x89   : > { %1246 = vmatprep.subr.bf16.mxu0 %v2574_v57  ;;  %1318 = vmatpush2.bf16.msra.mxu1 %v2573_v58  ;;  %v2649_v57 = vld [vmem:[#allocation5 + $0x2a8] ss:$12 sps:$4 sm:$0xff]   ;;  %v2663_v58 = vld [vmem:[#allocation5 + $0x320] ss:$12 sps:$4 sm:$0xff]  }
  0x8a   : > { %1319 = vmatprep.subr.bf16.mxu1 %v2577_v59  ;;  %v2650_v59 = vld [vmem:[#allocation5 + $0x1e8] ss:$12 sps:$4 sm:$0xff]  }
  0x8c   : > { %1247 = vmatpush2.bf16.msra.mxu0 %v2576_v60  ;;  %v2652_v60 = vld [vmem:[#allocation5 + $0x290] ss:$12 sps:$4 sm:$0xff]  }
  0x8d   : > { %1248 = vmatprep.subr.bf16.mxu0 %v2580_v62  ;;  %1320 = vmatpush2.bf16.msra.mxu1 %v2579_v61  ;;  %v2651_v61 = vld [vmem:[%s3013_s14 + $0x60] ss:$20 sps:$4 sm:$0xff]  }
  0x8e   : > { %1321 = vmatprep.subr.bf16.mxu1 %v2583_v63  ;;  %v2665_v62 = vld [vmem:[#allocation5 + $0x308] ss:$12 sps:$4 sm:$0xff]   ;;  %v2654_v63 = vld [vmem:[#allocation5 + $0x1d0] ss:$12 sps:$4 sm:$0xff]  }
  0x90   : > { %1249 = vmatpush2.bf16.msra.mxu0 %v2582_v1  ;;  %v2657_v1 = vld [vmem:[#allocation5 + $0x1b8] ss:$12 sps:$4 sm:$0xff]  }
  0x91   : > { %2243 = vmatprep.subr.msk.bf16.mxu0 %vm1208_vm0, %v2589_v3  ;;  %1322 = vmatpush2.bf16.msra.mxu1 %v2588_v4  ;;  %v2658_v3 = vld [vmem:[%s3013_s14 + $0x88] ss:$20 sps:$4 sm:$0xff]   ;;  %v2661_v4 = vld [vmem:[#allocation5 + $0x1a0] ss:$12 sps:$4 sm:$0xff]  }
  0x92   : > { %2287 = vmatprep.subr.bf16.mxu1 %v2595_v6  ;;  %v2662_v6 = vld [vmem:[#allocation5 + $0x248] ss:$12 sps:$4 sm:$0xff]  }
  0x93   : > { %1251 = vmatmul.mubr.bf16.vlgmr.msra.gmra.mxu0 %v3032_v2 }
  0x94   : > { %1371 = vmatpush1.bf16.msra.mxu0 %v1210_v7  ;;  %1260 = vmatprep.mubr.bf16.mxu0 %v3039_v9  ;;  %v2664_v7 = vld [vmem:[#allocation5 + $0x188] ss:$12 sps:$4 sm:$0xff]  }
  0x95   : > { %1324 = vmatmul.mubr.bf16.vlgmr.msra.gmra.mxu1 %v3035_v5  ;;  %1372 = vmatprep.subr.bf16.mxu0 %v2601_v10 }
  0x96   : > { %2288 = vmatpush3.bf16.msra.mxu1 %v2596_v8  ;;  %1333 = vmatprep.mubr.bf16.mxu1 %v3043_v11 }
  0x97   : > { %2289 = vmatprep.subr.bf16.mxu1 %v2603_v12 }
  0x98   : > { %1373 = vmatpush1.bf16.msra.mxu0 %v2599_v13 }
  0x99   : > { %1374 = vmatprep.subr.bf16.mxu0 %v2611_v15 }
  0x9a   : > { %2290 = vmatpush3.bf16.msra.mxu1 %v2606_v16 }
  0x9b   : > { %1261 = vmatmul.mubr.bf16.gmra.mxu0 %v3049_v14  ;;  %2291 = vmatprep.subr.bf16.mxu1 %v2608_v18 }
  0x9c   : > { %1375 = vmatpush1.bf16.msra.mxu0 %v2609_v19  ;;  %1270 = vmatprep.mubr.bf16.mxu0 %v3056_v21 }
  0x9d   : > { %1334 = vmatmul.mubr.bf16.gmra.mxu1 %v3053_v17  ;;  %1376 = vmatprep.subr.bf16.mxu0 %v2623_v22 }
  0x9e   : > { %2292 = vmatpush3.bf16.msra.mxu1 %v2612_v20  ;;  %1343 = vmatprep.mubr.bf16.mxu1 %v3059_v23 }
  0x9f   : > { %2293 = vmatprep.subr.bf16.mxu1 %v2616_v24 }
  0xa0   : > { %1377 = vmatpush1.bf16.msra.mxu0 %v2621_v26 }
  0xa1   : > { %1378 = vmatprep.subr.bf16.mxu0 %v2636_v28 }
  0xa2   : > { %2294 = vmatpush3.bf16.msra.mxu1 %v2619_v25 }
  0xa3   : > { %1271 = vmatmul.mubr.bf16.gmra.mxu0 %v3065_v27  ;;  %2295 = vmatprep.subr.bf16.mxu1 %v2624_v29 }
  0xa4   : > { %1280 = vmatprep.mubr.bf16.mxu0 %v3072_v31  ;;  %1379 = vmatpush1.bf16.msra.mxu0 %v2634_v33 }
  0xa5   : > { %1344 = vmatmul.mubr.bf16.gmra.mxu1 %v3069_v30  ;;  %2327 = vmatprep.subr.bf16.mxu0 %v2641_v34 }
  0xa6   : > { %2296 = vmatpush3.bf16.msra.mxu1 %v2625_v32  ;;  %1353 = vmatprep.mubr.bf16.mxu1 %v3075_v35 }
  0xa7   : > { %2297 = vmatprep.subr.bf16.mxu1 %v2629_v36 }
  0xaa   : > { %2298 = vmatpush3.bf16.msra.mxu1 %v2632_v38 }
  0xab   : > { %1281 = vmatmul.mubr.bf16.gmra.mxu0 %v3081_v37  ;;  %2299 = vmatprep.subr.bf16.mxu1 %v2637_v39 }
  0xac   : > { %1396 = vmatprep.mubr.bf16.mxu0 %v2855_v43 }
  0xad   : > { %1354 = vmatmul.mubr.bf16.gmra.mxu1 %v3085_v40 }
  0xae   : > { %2300 = vmatpush3.bf16.msra.mxu1 %v2638_v41  ;;  %1469 = vmatprep.mubr.bf16.mxu1 %v3024_v48  ;;  %v2647_v48 = vld [vmem:[#allocation5 + $0x2c0] ss:$12 sps:$4 sm:$0xff]  }
  0xaf   : > { %2301 = vmatprep.subr.bf16.mxu1 %v2640_v42 }
  0xb2   : > { %2302 = vmatpush3.bf16.msra.mxu1 %v2642_v45 }
  0xb3   : > { %2244 = vmatmul.mubr.msk.bf16.vlgmr.msra.gmra.mxu0 %vm1195_vm1, %v3091_v46  ;;  %2394 = vmatprep.subr.msk.bf16.mxu1 %vm1208_vm0, %v2653_v44 }
  0xb4   : > { %2328 = vmatpush3.bf16.msra.mxu0 %v2643_v47  ;;  %1406 = vmatprep.mubr.bf16.mxu0 %v2855_v43 }
  0xb5   : > { %1470 = vmatmul.mubr.bf16.vlgmr.msra.gmra.mxu1 %v3032_v2  ;;  %2329 = vmatprep.subr.bf16.mxu0 %v2644_v49  ;;  %v2659_v2 = vld [vmem:[#allocation5 + $0x260] ss:$12 sps:$4 sm:$0xff]  }
  0xb6   : > { %1477 = vmatprep.mubr.bf16.mxu1 %v3039_v9  ;;  %2377 = vmatpush3.bf16.msra.mxu1 %v1216_v50 }
  0xb7   : > { %2378 = vmatprep.subr.bf16.mxu1 %v2656_v51 }
  0xb8   : > { %2330 = vmatpush3.bf16.msra.mxu0 %v2645_v53 }
  0xb9   : > { %2331 = vmatprep.subr.bf16.mxu0 %v2647_v48 }
  0xba   : > { %2379 = vmatpush3.bf16.msra.mxu1 %v2656_v51 }
  0xbb   : > { %2245 = vmatmul.mubr.msk.bf16.gmra.mxu0 %vm1195_vm1, %v2646_v54  ;;  %2380 = vmatprep.subr.bf16.mxu1 %v2660_v55 }
  0xbc   : > { %2332 = vmatpush3.bf16.msra.mxu0 %v2648_v56  ;;  %1416 = vmatprep.mubr.bf16.mxu0 %v2855_v43 }
  0xbd   : > { %1478 = vmatmul.mubr.bf16.gmra.mxu1 %v3049_v14  ;;  %2333 = vmatprep.subr.bf16.mxu0 %v2649_v57 }
  0xbe   : > { %1485 = vmatprep.mubr.bf16.mxu1 %v3056_v21  ;;  %2381 = vmatpush3.bf16.msra.mxu1 %v2660_v55 }
  0xbf   : > { %2382 = vmatprep.subr.bf16.mxu1 %v2663_v58 }
  0xc0   : > { %2334 = vmatpush3.bf16.msra.mxu0 %v2650_v59 }
  0xc1   : > { %2335 = vmatprep.subr.bf16.mxu0 %v2652_v60 }
  0xc2   : > { %2383 = vmatpush3.bf16.msra.mxu1 %v2663_v58 }
  0xc3   : > { %2246 = vmatmul.mubr.msk.bf16.gmra.mxu0 %vm1195_vm1, %v2651_v61  ;;  %2384 = vmatprep.subr.bf16.mxu1 %v2665_v62 }
  0xc4   : > { %2336 = vmatpush3.bf16.msra.mxu0 %v2654_v63  ;;  %1426 = vmatprep.mubr.bf16.mxu0 %v2855_v43 }
  0xc5   : > { %1486 = vmatmul.mubr.bf16.gmra.mxu1 %v3065_v27  ;;  %2337 = vmatprep.subr.bf16.mxu0 %v2655_v0 }
  0xc6   : > { %1493 = vmatprep.mubr.bf16.mxu1 %v3072_v31  ;;  %2385 = vmatpush3.bf16.msra.mxu1 %v2665_v62  ;;  %v466_v62 = vld [vmem:[#allocation7] sm:$0xff] }
  0xc7   : > { %v483_v63 = vunpack.c.h.bf16 %v466_v62 }
  0xc8   : > { %2338 = vmatpush3.bf16.msra.mxu0 %v2657_v1 }
  0xc9   : > { %2339 = vmatprep.subr.bf16.mxu0 %v2659_v2  ;;  %v482_v2 = vunpack.c.l.bf16 %v466_v62  ;;  %v470_v62 = vld [vmem:[#allocation7 + $0x18] sm:$0xff] }
  0xcb   : > { %2247 = vmatmul.mubr.msk.bf16.gmra.mxu0 %vm1195_vm1, %v2658_v3 }
  0xcc   : > { %2340 = vmatpush3.bf16.msra.mxu0 %v2661_v4  ;;  %1534 = vmatprep.mubr.bf16.mxu0 %v3028_v52 }
  0xcd   : > { %1494 = vmatmul.mubr.bf16.gmra.mxu1 %v3081_v37  ;;  %2341 = vmatprep.subr.bf16.mxu0 %v2662_v6  ;;  %v468_v6 = vld [vmem:[#allocation7 + $0xc] sm:$0xff] }
  0xce   : > { %2386 = vmatprep.mubr.msk.bf16.mxu1 %vm1195_vm1, %v3091_v46 }
  0xd0   : > { %2342 = vmatpush3.bf16.msra.mxu0 %v2664_v7 }
  0xd3   : > { %1535 = vmatmul.mubr.bf16.vlgmr.msra.gmra.mxu0 %v3035_v5 }
  0xd4   : > { %1542 = vmatprep.mubr.bf16.mxu0 %v3043_v11 }
  0xd5   : > { %2387 = vmatmul.mubr.msk.bf16.vlgmr.msra.gmra.mxu1 %vm1195_vm1, %v2646_v54 }
  0xd6   : > { %2390 = vmatprep.mubr.msk.bf16.mxu1 %vm1195_vm1, %v2651_v61 }
  0xdb   : > { %1543 = vmatmul.mubr.bf16.gmra.mxu0 %v3053_v17 }
  0xdc   : > { %1550 = vmatprep.mubr.bf16.mxu0 %v3059_v23 }
  0xdd   : > { %2391 = vmatmul.mubr.msk.bf16.gmra.mxu1 %vm1195_vm1, %v2658_v3 }
  0xe3   : > { %1551 = vmatmul.mubr.bf16.gmra.mxu0 %v3069_v30 }
  0xe4   : > { %1558 = vmatprep.mubr.bf16.mxu0 %v3075_v35 }
  0xeb   : > { %1559 = vmatmul.mubr.bf16.gmra.mxu0 %v3085_v40 }
 0x153   : > { %v3123_v52 = vpop.f32.mrf.mxu0 }
 0x155   : > { %v1254_v5 = vpop.f32.mrf.mxu0  ;;  %v3125_v8 = vpop.f32.mrf.mxu1 }
 0x156   : > { %v1255_v7 = vadd.f32 %v1254_v5, %v483_v63  ;;  %v489_v63 = vunpack.c.h.bf16 %v470_v62 }
 0x157   : > { %v3127_v9 = vpop.f32.mrf.mxu0  ;;  %v3129_v10 = vpop.f32.mrf.mxu1 }
 0x159   : > { %v3131_v11 = vpop.f32.mrf.mxu0  ;;  %v3133_v12 = vpop.f32.mrf.mxu1 }
 0x15b   : > { %v3135_v13 = vpop.f32.mrf.mxu0  ;;  %v3137_v14 = vpop.f32.mrf.mxu1 }
 0x15d   : > { %v3139_v15 = vpop.f32.mrf.mxu0  ;;  %v3141_v16 = vpop.f32.mrf.mxu1 }
 0x15f   : > { %v3143_v17 = vpop.f32.mrf.mxu0  ;;  %v3145_v18 = vpop.f32.mrf.mxu1 }
 0x161   : > { %v3147_v19 = vpop.f32.mrf.mxu0  ;;  %v3149_v20 = vpop.f32.mrf.mxu1 }
 0x163   : > { %v3151_v21 = vpop.f32.mrf.mxu0  ;;  %v3153_v22 = vpop.f32.mrf.mxu1 }
 0x165   : > { %v3155_v23 = vpop.f32.mrf.mxu0  ;;  %v3157_v24 = vpop.f32.mrf.mxu1 }
 0x167   : > { %v3159_v25 = vpop.f32.mrf.mxu0  ;;  %v3161_v26 = vpop.f32.mrf.mxu1 }
 0x169   : > { %v3163_v27 = vpop.f32.mrf.mxu0  ;;  %v3165_v28 = vpop.f32.mrf.mxu1 }
 0x16a   : > { %3693 = vst [vmem:[#allocation12_spill] sm:$0xff] %v3165_v28 }
 0x16b   : > { %v3167_v29 = vpop.f32.mrf.mxu0  ;;  %v3169_v30 = vpop.f32.mrf.mxu1 }
 0x16c   : > { %3694 = vst [vmem:[#allocation13_spill] sm:$0xff] %v3167_v29 }
 0x16d   : > { %v3171_v31 = vpop.f32.mrf.mxu0  ;;  %v3173_v32 = vpop.f32.mrf.mxu1 }
 0x16e   : > { %3695 = vst [vmem:[#allocation14_spill] sm:$0xff] %v3173_v32 }
 0x16f   : > { %v3175_v33 = vpop.f32.mrf.mxu0  ;;  %v3177_v34 = vpop.f32.mrf.mxu1 }
 0x170   : > { %3696 = vst [vmem:[#allocation15_spill] sm:$0xff] %v3175_v33  ;;  %3697 = vst [vmem:[#allocation16_spill] sm:$0xff] %v3177_v34 }
 0x171   : > { %v3179_v35 = vpop.f32.mrf.mxu0  ;;  %v3181_v36 = vpop.f32.mrf.mxu1 }
 0x172   : > { %3698 = vst [vmem:[#allocation17_spill] sm:$0xff] %v3179_v35  ;;  %3699 = vst [vmem:[#allocation18_spill] sm:$0xff] %v3181_v36  ;;  %v486_v36 = vunpack.c.h.bf16 %v468_v6  ;;  %v1253_v35 = vadd.f32 %v3123_v52, %v482_v2  ;;  %v488_v2 = vunpack.c.l.bf16 %v470_v62 }
 0x173   : > { %v3183_v37 = vpop.f32.mrf.mxu1  ;;  %v3185_v38 = vpop.f32.mrf.mxu0 }
 0x174   : > { %3700 = vst [vmem:[#allocation19_spill] sm:$0xff] %v3183_v37  ;;  %v467_v37 = vld [vmem:[#allocation7 + $0x8] ss:$12 sps:$4 sm:$0xff]   ;;  %v1259_v5 = vadd.f32 %v3131_v11, %v486_v36 }
 0x175   : > { %v1400_v39 = vpop.f32.mrf.mxu0  ;;  %v2303_v40 = vpop.f32.mrf.mxu1 }
 0x177   : > { %v3187_v41 = vpop.f32.mrf.mxu0  ;;  %v2304_v42 = vpop.f32.mrf.mxu1 }
 0x179   : > { %v3189_v43 = vpop.f32.mrf.mxu0  ;;  %v2306_v44 = vpop.f32.mrf.mxu1 }
 0x17b   : > { %v3191_v45 = vpop.f32.mrf.mxu0  ;;  %v2307_v46 = vpop.f32.mrf.mxu1 }
 0x17c   : > { %v2308_v11 = vadd.f32 %v2307_v46, %v2306_v44  ;;  %v474_v44 = vld [vmem:[#allocation7 + $0x30] sm:$0xff] }
 0x17d   : > { %v3193_v47 = vpop.f32.mrf.mxu0  ;;  %v3195_v49 = vpop.f32.mrf.mxu1 }
 0x17f   : > { %v3197_v50 = vpop.f32.mrf.mxu0  ;;  %v3199_v51 = vpop.f32.mrf.mxu1 }
 0x181   : > { %v3201_v53 = vpop.f32.mrf.mxu0  ;;  %v3203_v48 = vpop.f32.mrf.mxu1 }
 0x183   : > { %v3205_v54 = vpop.f32.mrf.mxu0  ;;  %v3207_v55 = vpop.f32.mrf.mxu1 }
 0x184   : > { %3701 = vst [vmem:[#allocation20_spill] sm:$0xff] %v3205_v54 }
 0x185   : > { %v3209_v56 = vpop.f32.mrf.mxu0  ;;  %v3211_v57 = vpop.f32.mrf.mxu1 }
 0x187   : > { %v3213_v58 = vpop.f32.mrf.mxu0  ;;  %v3215_v59 = vpop.f32.mrf.mxu1 }
 0x188   : > { %3702 = vst [vmem:[#allocation21_spill] sm:$0xff] %v3213_v58  ;;  %v485_v58 = vunpack.c.l.bf16 %v468_v6  ;;  %v472_v6 = vld [vmem:[#allocation7 + $0x24] sm:$0xff] }
 0x189   : > { %v3217_v60 = vpop.f32.mrf.mxu0  ;;  %v3219_v61 = vpop.f32.mrf.mxu1 }
 0x18a   : > { %3703 = vst [vmem:[#allocation22_spill] sm:$0xff] %v3217_v60  ;;  %v484_v60 = vunpack.c.l.bf16 %v467_v37  ;;  %v1257_v52 = vadd.f32 %v3127_v9, %v485_v58  ;;  %v491_v58 = vunpack.c.l.bf16 %v472_v6 }
 0x18b   : > { %v3221_v0 = vpop.f32.mrf.mxu0  ;;  %v3223_v1 = vpop.f32.mrf.mxu1 }
 0x18c   : > { %3704 = vst [vmem:[#allocation23_spill] sm:$0xff] %v3221_v0  ;;  %v1330_v54 = vadd.f32 %v3133_v12, %v1257_v52  ;;  %v494_v52 = vunpack.c.l.bf16 %v474_v44 }
 0x18d   : > { %v3225_v3 = vpop.f32.mrf.mxu0  ;;  %v3227_v4 = vpop.f32.mrf.mxu1 }
 0x18e   : > { %3705 = vst [vmem:[#allocation24_spill] sm:$0xff] %v3225_v3  ;;  %3706 = vst [vmem:[#allocation25_spill] sm:$0xff] %v3227_v4  ;;  %v2305_v3 = vadd.f32 %v2304_v42, %v2303_v40  ;;  %v1328_v4 = vadd.f32 %v3129_v10, %v1255_v7  ;;  %v487_v42 = vunpack.c.h.bf16 %v467_v37  ;;  %v1332_v7 = vadd.f32 %v3137_v14, %v1259_v5 }
 0x18f   : > { %v3229_v33 = vpop.f32.mrf.mxu0  ;;  %v3231_v32 = vpop.f32.mrf.mxu1  ;;  %v1263_v37 = vadd.f32 %v3135_v13, %v488_v2 }
 0x190   : > { %3707 = vst [vmem:[#allocation26_spill] sm:$0xff] %v3229_v33  ;;  %3708 = vst [vmem:[#allocation27_spill] sm:$0xff] %v3231_v32  ;;  %v1326_v33 = vadd.f32 %v3125_v8, %v1253_v35  ;;  %v1472_v10 = vadd.f32 %v2305_v3, %v484_v60  ;;  %v492_v8 = vunpack.c.h.bf16 %v472_v6  ;;  %v495_v3 = vunpack.c.h.bf16 %v474_v44 }
 0x191   : > { %v3234_v34 = vpop.f32.mrf.mxu0  ;;  %v3236_v0 = vpop.f32.mrf.mxu1 }
 0x192   : > { %3709 = vst [vmem:[#allocation28_spill] sm:$0xff] %v3234_v34  ;;  %3710 = vst [vmem:[#allocation29_spill] sm:$0xff] %v3236_v0  ;;  %v3244_v34 = vadd.f32 %v1400_v39, %v1328_v4  ;;  %v3246_v0 = vld [vmem:[#allocation7 + $0x20] ss:$12 sps:$4 sm:$0xff]   ;;  %v3253_v9 = vadd.f32 %v3185_v38, %v1326_v33  ;;  %v1475_v33 = vadd.f32 %v2308_v11, %v487_v42 }
 0x193   : > { %v2343_v29 = vpop.f32.mrf.mxu0  ;;  %v3240_v28 = vpop.f32.mrf.mxu1  ;;  %v490_v4 = vunpack.c.l.bf16 %v3246_v0  ;;  %v2311_v38 = vadd.f32 %v3199_v51, %v3195_v49  ;;  %v1269_v13 = vadd.f32 %v3147_v19, %v492_v8  ;;  %v493_v2 = vunpack.c.h.bf16 %v3246_v0  ;;  %v476_v42 = vld [vmem:[#allocation7 + $0x3c] sm:$0xff] }
 0x194   : > { %3711 = vst [vmem:[#allocation30_spill] sm:$0xff] %v3240_v28  ;;  %v1265_v28 = vadd.f32 %v3139_v15, %v489_v63  ;;  %v1336_v49 = vadd.f32 %v3141_v16, %v1263_v37  ;;  %v1267_v51 = vadd.f32 %v3143_v17, %v491_v58  ;;  %v2314_v0 = vadd.f32 %v3207_v55, %v3203_v48 }
 0x195   : > { %v2344_v32 = vpop.f32.mrf.mxu0  ;;  %v3248_v40 = vpop.f32.mrf.mxu1  ;;  %v1342_v16 = vadd.f32 %v3153_v22, %v1269_v13  ;;  %v1275_v17 = vadd.f32 %v3155_v23, %v495_v3  ;;  %v1273_v55 = vadd.f32 %v3151_v21, %v494_v52  ;;  %v480_v13 = vld [vmem:[#allocation7 + $0x54] sm:$0xff] }
 0x196   : > { %v2345_v36 = vadd.f32 %v2344_v32, %v2343_v29  ;;  %v3259_v29 = vadd.f32 %v3189_v43, %v1332_v7  ;;  %v1632_v32 = vadd.f32 %v3244_v34, %v3253_v9  ;;  %v1338_v12 = vadd.f32 %v3145_v18, %v1265_v28  ;;  %v3283_v28 = vld [vmem:[#allocation7 + $0x38] ss:$12 sps:$4 sm:$0xff]  }
 0x197   : > { %v2346_v35 = vpop.f32.mrf.mxu0  ;;  %v1601_v39 = vpop.f32.mrf.mxu1  ;;  %v3272_v43 = vadd.f32 %v3187_v41, %v1330_v54  ;;  %v1480_v54 = vadd.f32 %v2311_v38, %v490_v4  ;;  %v498_v7 = vunpack.c.h.bf16 %v476_v42  ;;  %v3292_v8 = vadd.f32 %v3191_v45, %v1336_v49 }
 0x198   : > { %v1537_v62 = vadd.f32 %v2345_v36, %v1472_v10  ;;  %v3281_v19 = vadd.f32 %v3193_v47, %v1338_v12  ;;  %v1340_v48 = vadd.f32 %v3149_v20, %v1267_v51  ;;  %v3299_v22 = vadd.f32 %v3201_v53, %v1342_v16 }
 0x199   : > { %v2347_v14 = vpop.f32.mrf.mxu0  ;;  %v3261_v15 = vpop.f32.mrf.mxu1  ;;  %v1636_v18 = vadd.f32 %v3259_v29, %v3272_v43  ;;  %v1483_v44 = vadd.f32 %v2314_v0, %v493_v2  ;;  %v1348_v21 = vadd.f32 %v3161_v26, %v1275_v17  ;;  %v1279_v53 = vadd.f32 %v3163_v27, %v498_v7 }
 0x19a   : > { %v2348_v46 = vadd.f32 %v2347_v14, %v2346_v35  ;;  %v3267_v60 = vadd.f32 %v1601_v39, %v1537_v62  ;;  %v497_v35 = vunpack.c.l.bf16 %v476_v42  ;;  %v496_v39 = vunpack.c.l.bf16 %v3283_v28  ;;  %v478_v62 = vld [vmem:[#allocation7 + $0x48] sm:$0xff]  ;;  %v3712_v42 = vld [vmem:[#allocation20_spill] sm:$0xff] }
 0x19b   : > { %v2349_v5 = vpop.f32.mrf.mxu0  ;;  %v1604_v63 = vpop.f32.mrf.mxu1  ;;  %v1640_v45 = vadd.f32 %v3281_v19, %v3292_v8  ;;  %v2317_v14 = vadd.f32 %v3215_v59, %v3211_v57  ;;  %v3313_v38 = vadd.f32 %v3197_v50, %v1340_v48  ;;  %v500_v12 = vunpack.c.l.bf16 %v478_v62  ;;  %v479_v50 = vld [vmem:[#allocation7 + $0x50] ss:$12 sps:$4 sm:$0xff]  }
 0x19c   : > { %v1540_v6 = vadd.f32 %v2348_v46, %v1475_v33  ;;  %v1633_v10 = vadd.f32 %v1632_v32, %v3267_v60  ;;  %v501_v33 = vunpack.c.h.bf16 %v478_v62  ;;  %v499_v3 = vunpack.c.h.bf16 %v3283_v28 }
 0x19d   : > { %v2350_v41 = vpop.f32.mrf.mxu0  ;;  %v3301_v37 = vpop.f32.mrf.mxu1  ;;  %v1346_v59 = vadd.f32 %v3157_v24, %v1273_v55  ;;  %v1644_v26 = vadd.f32 %v3299_v22, %v3313_v38  ;;  %v3322_v27 = vadd.f32 %v3209_v56, %v1348_v21  ;;  %v1488_v2 = vadd.f32 %v2317_v14, %v496_v39  ;;  %v3717_v39 = vld [vmem:[#allocation27_spill] sm:$0xff]  ;;  %v3718_v55 = vld [vmem:[#allocation16_spill] sm:$0xff]  ;;  %v3720_v14 = vld [vmem:[#allocation17_spill] sm:$0xff] }
 0x19e   : > { %v2351_v11 = vadd.f32 %v2350_v41, %v2349_v5  ;;  %v3287_v36 = vadd.f32 %v1604_v63, %v1540_v6  ;;  %1634 = vadd.xlane.f32.xlu0 %v1633_v10  ;;  %v2320_v6 = vadd.f32 %v3223_v1, %v3219_v61  ;;  %v1352_v24 = vadd.f32 %v3169_v30, %v1279_v53  ;;  %v3713_v61 = vld [vmem:[#allocation12_spill] sm:$0xff]  ;;  %v3715_v30 = vld [vmem:[#allocation22_spill] sm:$0xff] }
 0x19f   : > { %v2352_v47 = vpop.f32.mrf.mxu0  ;;  %v1617_v52 = vpop.f32.mrf.mxu1  ;;  %v503_v51 = vunpack.c.l.bf16 %v480_v13  ;;  %v3332_v56 = vadd.f32 %v3712_v42, %v1346_v59  ;;  %v504_v28 = vunpack.c.h.bf16 %v480_v13  ;;  %v502_v41 = vunpack.c.l.bf16 %v479_v50  ;;  %v3722_v13 = vld [vmem:[#allocation15_spill] sm:$0xff] }
 0x1a0   : > { %v1545_v58 = vadd.f32 %v2351_v11, %v1480_v54  ;;  %v1637_v4 = vadd.f32 %v1636_v18, %v3287_v36  ;;  %v3714_v11 = vld [vmem:[#allocation13_spill] sm:$0xff]  ;;  %v3340_v17 = vadd.f32 %v3715_v30, %v1352_v24  ;;  %v505_v21 = vunpack.c.h.bf16 %v479_v50  ;;  %v3726_v24 = vld [vmem:[#allocation23_spill] sm:$0xff] }
 0x1a1   : > { %v2353_v23 = vpop.f32.mrf.mxu0  ;;  %v1283_v16 = vadd.f32 %v3714_v11, %v500_v12  ;;  %v2393_v7 = vpop.f32.mrf.mxu1  ;;  %v3727_v42 = vld [vmem:[#allocation19_spill] sm:$0xff]  ;;  %v3729_v11 = vld [vmem:[#allocation28_spill] sm:$0xff] }
 0x1a2   : > { %v2354_v32 = vadd.f32 %v2353_v23, %v2352_v47  ;;  %1638 = vadd.xlane.f32.xlu0 %v1637_v4  ;;  %v3308_v20 = vadd.f32 %v3248_v40, %v1545_v58  ;;  %v1277_v40 = vadd.f32 %v3159_v25, %v497_v35  ;;  %v1285_v25 = vadd.f32 %v3171_v31, %v501_v33  ;;  %v3716_v35 = vld [vmem:[#allocation25_spill] sm:$0xff] }
 0x1a3   : > { %v2355_v46 = vpop.f32.mrf.mxu0  ;;  %v1491_v47 = vadd.f32 %v2320_v6, %v499_v3  ;;  %v2323_v58 = vadd.f32 %v3717_v39, %v3716_v35  ;;  %v3719_v23 = vld [vmem:[#allocation21_spill] sm:$0xff]  ;;  %v1287_v3 = vadd.f32 %v3722_v13, %v503_v51 }
 0x1a4   : > { %v1548_v5 = vadd.f32 %v2354_v32, %v1483_v44  ;;  %v1641_v57 = vadd.f32 %v1640_v45, %v3308_v20  ;;  %v1350_v1 = vadd.f32 %v3713_v61, %v1277_v40  ;;  %v1358_v62 = vadd.f32 %v3718_v55, %v1285_v25  ;;  %v1620_v40 = vpop.f32.mrf.mxu1 }
 0x1a5   : > { %v2356_v63 = vpop.f32.mrf.mxu0  ;;  %v1289_v32 = vadd.f32 %v3720_v14, %v504_v28 }
 0x1a6   : > { %v2357_v10 = vadd.f32 %v2356_v63, %v2355_v46  ;;  %1642 = vadd.xlane.f32.xlu1 %v1641_v57  ;;  %v3327_v49 = vadd.f32 %v3261_v15, %v1548_v5  ;;  %v1648_v15 = vadd.f32 %v3322_v27, %v3332_v56  ;;  %v3348_v45 = vadd.f32 %v3719_v23, %v1350_v1  ;;  %v3721_v46 = vld [vmem:[#allocation14_spill] sm:$0xff]  ;;  %v3723_v57 = vld [vmem:[#allocation24_spill] sm:$0xff] }
 0x1a7   : > { %v2358_v18 = vpop.f32.mrf.mxu0  ;;  %v1356_v12 = vadd.f32 %v3721_v46, %v1283_v16  ;;  %v3357_v59 = vadd.f32 %v3723_v57, %v1358_v62  ;;  %v1496_v63 = vadd.f32 %v2323_v58, %v502_v41 }
 0x1a8   : > { %v1553_v54 = vadd.f32 %v2357_v10, %v1488_v2  ;;  %v1645_v0 = vadd.f32 %v1644_v26, %v3327_v49  ;;  %v1652_v5 = vadd.f32 %v3340_v17, %v3348_v45  ;;  %v3725_v2 = vld [vmem:[#allocation30_spill] sm:$0xff] }
 0x1a9   : > { %v2359_v31 = vpop.f32.mrf.mxu0  ;;  %v3364_v25 = vadd.f32 %v3726_v24, %v1356_v12 }
 0x1aa   : > { %v3344_v4 = vadd.f32 %v1617_v52, %v1553_v54  ;;  %v2360_v48 = vadd.f32 %v2359_v31, %v2358_v18  ;;  %1646 = vadd.xlane.f32.xlu1 %v1645_v0  ;;  %v3724_v52 = vld [vmem:[#allocation29_spill] sm:$0xff]  ;;  %v1362_v18 = vadd.f32 %v3727_v42, %v1289_v32  ;;  %v3728_v0 = vld [vmem:[#allocation18_spill] sm:$0xff] }
 0x1ab   : > { %v2361_v44 = vpop.f32.mrf.mxu0  ;;  %v2326_v6 = vadd.f32 %v3725_v2, %v3724_v52  ;;  %v1360_v61 = vadd.f32 %v3728_v0, %v1287_v3  ;;  %v1656_v41 = vadd.f32 %v3357_v59, %v3364_v25 }
 0x1ac   : > { %v1556_v53 = vadd.f32 %v2360_v48, %v1491_v47  ;;  %v1649_v33 = vadd.f32 %v1648_v15, %v3344_v4  ;;  %v3372_v16 = vadd.f32 %v3729_v11, %v1362_v18  ;;  %v3730_v47 = vld [vmem:[#allocation26_spill] sm:$0xff] }
 0x1ad   : > { %v2362_v26 = vpop.f32.mrf.mxu0  ;;  %v1499_v15 = vadd.f32 %v2326_v6, %v505_v21  ;;  %v3378_v35 = vadd.f32 %v3730_v47, %v1360_v61 }
 0x1ae   : > { %v3361_v50 = vadd.f32 %v1620_v40, %v1556_v53  ;;  %v2363_v10 = vadd.f32 %v2362_v26, %v2361_v44  ;;  %1650 = vadd.xlane.f32.xlu0 %v1649_v33 }
 0x1af   : > { %v2364_v51 = vpop.f32.mrf.mxu0  ;;  %v1660_v48 = vadd.f32 %v3372_v16, %v3378_v35 }
 0x1b0   : > { %v1561_v28 = vadd.f32 %v2363_v10, %v1496_v63  ;;  %v1653_v54 = vadd.f32 %v1652_v5, %v3361_v50 }
 0x1b1   : > { %v2365_v1 = vpop.f32.mrf.mxu0 }
 0x1b2   : > { %v2366_v30 = vadd.f32 %v2365_v1, %v2364_v51  ;;  %1654 = vadd.xlane.f32.xlu1 %v1653_v54  ;;  %v3375_v31 = vadd.f32 %v3301_v37, %v1561_v28 }
 0x1b4   : > { %v1564_v39 = vadd.f32 %v2366_v30, %v1499_v15  ;;  %v1657_v58 = vadd.f32 %v1656_v41, %v3375_v31 }
 0x1b6   : > { %1658 = vadd.xlane.f32.xlu0 %v1657_v58  ;;  %v3383_v55 = vadd.f32 %v2393_v7, %v1564_v39 }
 0x1b8   : > { %v1661_v62 = vadd.f32 %v1660_v48, %v3383_v55 }
 0x1ba   : > { %1662 = vadd.xlane.f32.xlu1 %v1661_v62 }
 0x227   : > { %v1635_v23 = vpop.xlane.xlu0 %1634 }
 0x228   : > { %v1665_v44 = vmul.f32 0.0026041667, %v1635_v23 }
 0x22a   : > { %v3387_v37 = vsub.f32 %v3253_v9, %v1665_v44  ;;  %v3390_v14 = vsub.f32 %v3244_v34, %v1665_v44  ;;  %v3393_v32 = vsub.f32 %v3267_v60, %v1665_v44 }
 0x22b   : > { %v1639_v21 = vpop.xlane.xlu0 %1638 }
 0x22c   : > { %v1666_v53 = vmul.f32 0.0026041667, %v1639_v21  ;;  %v1697_v7 = vmul.f32 %v3387_v37, %v3387_v37  ;;  %v1698_v33 = vmul.f32 %v3390_v14, %v3390_v14  ;;  %v1699_v46 = vmul.f32 %v3393_v32, %v3393_v32 }
 0x22e   : > { %v3402_v9 = vsub.f32 %v3272_v43, %v1666_v53  ;;  %v3405_v34 = vsub.f32 %v3259_v29, %v1666_v53  ;;  %v3408_v60 = vsub.f32 %v3287_v36, %v1666_v53  ;;  %v1721_v12 = vadd.f32 %v1698_v33, %v1697_v7 }
 0x22f   : > { %v1643_v13 = vpop.xlane.xlu1 %1642 }
 0x230   : > { %v1667_v3 = vmul.f32 0.0026041667, %v1643_v13  ;;  %v1722_v5 = vadd.f32 %v1721_v12, %v1699_v46  ;;  %v1700_v57 = vmul.f32 %v3402_v9, %v3402_v9  ;;  %v1701_v40 = vmul.f32 %v3405_v34, %v3405_v34 }
 0x231   : > { %v1702_v43 = vmul.f32 %v3408_v60, %v3408_v60 }
 0x232   : > { %v3417_v26 = vsub.f32 %v3292_v8, %v1667_v3  ;;  %v3420_v29 = vsub.f32 %v3281_v19, %v1667_v3  ;;  %v3423_v36 = vsub.f32 %v3308_v20, %v1667_v3  ;;  %1723 = vadd.xlane.f32.xlu0 %v1722_v5  ;;  %v1725_v63 = vadd.f32 %v1701_v40, %v1700_v57 }
 0x233   : > { %v1647_v52 = vpop.xlane.xlu1 %1646 }
 0x234   : > { %v1668_v2 = vmul.f32 0.0026041667, %v1647_v52  ;;  %v1726_v6 = vadd.f32 %v1725_v63, %v1702_v43  ;;  %v1703_v10 = vmul.f32 %v3417_v26, %v3417_v26  ;;  %v1704_v24 = vmul.f32 %v3420_v29, %v3420_v29 }
 0x235   : > { %v1705_v8 = vmul.f32 %v3423_v36, %v3423_v36 }
 0x236   : > { %v3432_v19 = vsub.f32 %v3313_v38, %v1668_v2  ;;  %v3435_v20 = vsub.f32 %v3299_v22, %v1668_v2  ;;  %v3438_v51 = vsub.f32 %v3327_v49, %v1668_v2  ;;  %1727 = vadd.xlane.f32.xlu1 %v1726_v6  ;;  %v1729_v42 = vadd.f32 %v1704_v24, %v1703_v10 }
 0x237   : > { %v1651_v18 = vpop.xlane.xlu0 %1650  ;;  %v1803_v24 = vlaneseq }
 0x238   : > { %v1669_v28 = vmul.f32 0.0026041667, %v1651_v18  ;;  %v1730_v54 = vadd.f32 %v1729_v42, %v1705_v8  ;;  %v1706_v0 = vmul.f32 %v3432_v19, %v3432_v19  ;;  %v1707_v61 = vmul.f32 %v3435_v20, %v3435_v20 }
 0x239   : > { %v1708_v38 = vmul.f32 %v3438_v51, %v3438_v51 }
 0x23a   : > { %v3447_v22 = vsub.f32 %v3332_v56, %v1669_v28  ;;  %v3450_v49 = vsub.f32 %v3322_v27, %v1669_v28  ;;  %v3453_v41 = vsub.f32 %v3344_v4, %v1669_v28  ;;  %1731 = vadd.xlane.f32.xlu0 %v1730_v54  ;;  %v1733_v1 = vadd.f32 %v1707_v61, %v1706_v0 }
 0x23b   : > { %v1655_v11 = vpop.xlane.xlu1 %1654  ;;  %v1804_v28 = vshrl.u32 %v1803_v24, 7 }
 0x23c   : > { %v1670_v15 = vmul.f32 0.0026041667, %v1655_v11  ;;  %v1734_v30 = vadd.f32 %v1733_v1, %v1708_v38  ;;  %v1709_v47 = vmul.f32 %v3447_v22, %v3447_v22  ;;  %v1710_v39 = vmul.f32 %v3450_v49, %v3450_v49  ;;  %v1801_v11 = vld [vmem:[%s3673_s3] sm:$0x7] }
 0x23d   : > { %v1711_v56 = vmul.f32 %v3453_v41, %v3453_v41  ;;  %v1805_v38 = vsub.s32 0, %v1804_v28 }
 0x23e   : > { %v3462_v27 = vsub.f32 %v3348_v45, %v1670_v15  ;;  %v3465_v4 = vsub.f32 %v3340_v17, %v1670_v15  ;;  %v3468_v58 = vsub.f32 %v3361_v50, %v1670_v15  ;;  %1735 = vadd.xlane.f32.xlu1 %v1734_v30  ;;  %v1737_v48 = vadd.f32 %v1710_v39, %v1709_v47  ;;  %v1842_v39 = vld [vmem:[%s3674_s4] sm:$0x7] }
 0x23f   : > { %v1659_v62 = vpop.xlane.xlu0 %1658  ;;  %v1809_v15 = vsub.s32 1, %v1804_v28  ;;  %v1813_v30 = vsub.s32 2, %v1804_v28 }
 0x240   : > { %v1671_v23 = vmul.f32 0.0026041667, %v1659_v62  ;;  %v1738_v44 = vadd.f32 %v1737_v48, %v1711_v56  ;;  %v1712_v21 = vmul.f32 %v3462_v27, %v3462_v27  ;;  %v1713_v53 = vmul.f32 %v3465_v4, %v3465_v4 }
 0x241   : > { %v1714_v45 = vmul.f32 %v3468_v58, %v3468_v58  ;;  %v3512_v48 = vrot.slane %v1801_v11, %v1805_v38 }
 0x242   : > { %v3477_v17 = vsub.f32 %v3364_v25, %v1671_v23  ;;  %v3480_v50 = vsub.f32 %v3357_v59, %v1671_v23  ;;  %v3483_v7 = vsub.f32 %v3375_v31, %v1671_v23  ;;  %1739 = vadd.xlane.f32.xlu0 %v1738_v44  ;;  %v1741_v33 = vadd.f32 %v1713_v53, %v1712_v21 }
 0x243   : > { %v1663_v46 = vpop.xlane.xlu1 %1662  ;;  %v3514_v23 = vrot.slane %v1801_v11, %v1809_v15  ;;  %v3516_v44 = vrot.slane %v1801_v11, %v1813_v30 }
 0x244   : > { %v1672_v12 = vmul.f32 0.0026041667, %v1663_v46  ;;  %v1742_v13 = vadd.f32 %v1741_v33, %v1714_v45  ;;  %v1715_v3 = vmul.f32 %v3477_v17, %v3477_v17  ;;  %v1716_v5 = vmul.f32 %v3480_v50, %v3480_v50 }
 0x245   : > { %v1717_v25 = vmul.f32 %v3483_v7, %v3483_v7  ;;  %v3518_v45 = vrot.slane %v1842_v39, %v1805_v38  ;;  %v3520_v33 = vrot.slane %v1842_v39, %v1809_v15  ;;  %v3522_v46 = vrot.slane %v1842_v39, %v1813_v30 }
 0x246   : > { %v3492_v59 = vsub.f32 %v3378_v35, %v1672_v12  ;;  %v3495_v31 = vsub.f32 %v3372_v16, %v1672_v12  ;;  %v3498_v57 = vsub.f32 %v3383_v55, %v1672_v12  ;;  %1743 = vadd.xlane.f32.xlu1 %v1742_v13  ;;  %v1745_v40 = vadd.f32 %v1716_v5, %v1715_v3 }
 0x248   : > { %v1746_v43 = vadd.f32 %v1745_v40, %v1717_v25  ;;  %v1718_v63 = vmul.f32 %v3492_v59, %v3492_v59  ;;  %v1719_v52 = vmul.f32 %v3495_v31, %v3495_v31  ;;  %v1720_v35 = vmul.f32 %v3498_v57, %v3498_v57 }
 0x24a   : > { %1747 = vadd.xlane.f32.xlu0 %v1746_v43  ;;  %v1749_v2 = vadd.f32 %v1719_v52, %v1718_v63 }
 0x24c   : > { %v1750_v6 = vadd.f32 %v1749_v2, %v1720_v35 }
 0x24e   : > { %1751 = vadd.xlane.f32.xlu1 %v1750_v6 }
 0x2bb   : > { %v1724_v16 = vpop.xlane.xlu0 %1723 }
 0x2bc   : > { %v1753_v10 = vmul.f32 0.0026041667, %v1724_v16 }
 0x2be   : > { %v1761_v55 = vadd.f32 1e-05, %v1753_v10 }
 0x2bf   : > { %v1728_v8 = vpop.xlane.xlu1 %1727 }
 0x2c0   : > { %2666 = vrsqrt.f32 %v1761_v55  ;;  %v1754_v42 = vmul.f32 0.0026041667, %v1728_v8 }
 0x2c2   : > { %v1762_v18 = vadd.f32 1e-05, %v1754_v42 }
 0x2c3   : > { %v1732_v54 = vpop.xlane.xlu0 %1731 }
 0x2c4   : > { %2668 = vrsqrt.f32 %v1762_v18  ;;  %v1755_v0 = vmul.f32 0.0026041667, %v1732_v54 }
 0x2c6   : > { %v1763_v61 = vadd.f32 1e-05, %v1755_v0 }
 0x2c7   : > { %v1736_v1 = vpop.xlane.xlu1 %1735 }
 0x2c8   : > { %2670 = vrsqrt.f32 %v1763_v61  ;;  %v1756_v47 = vmul.f32 0.0026041667, %v1736_v1 }
 0x2ca   : > { %v1764_v56 = vadd.f32 1e-05, %v1756_v47 }
 0x2cb   : > { %v1740_v62 = vpop.xlane.xlu0 %1739 }
 0x2cc   : > { %2672 = vrsqrt.f32 %v1764_v56  ;;  %v1757_v21 = vmul.f32 0.0026041667, %v1740_v62 }
 0x2cd   : > { %v2667_v53 = vpop.eup %2666 }
 0x2ce   : > { %v1777_v12 = vmul.f32 %v2667_v53, %v3387_v37  ;;  %v1778_v13 = vmul.f32 %v2667_v53, %v3390_v14  ;;  %v1779_v3 = vmul.f32 %v2667_v53, %v3393_v32  ;;  %v1765_v5 = vadd.f32 1e-05, %v1757_v21 }
 0x2cf   : > { %v1744_v25 = vpop.xlane.xlu1 %1743 }
 0x2d0   : > { %v1818_v40 = vmul.f32 %v3512_v48, %v1777_v12  ;;  %v1819_v43 = vmul.f32 %v3514_v23, %v1778_v13  ;;  %v1820_v63 = vmul.f32 %v3516_v44, %v1779_v3  ;;  %2674 = vrsqrt.f32 %v1765_v5 }
 0x2d1   : > { %v2669_v52 = vpop.eup %2668  ;;  %v1758_v35 = vmul.f32 0.0026041667, %v1744_v25 }
 0x2d2   : > { %v1859_v2 = vadd.f32 %v3518_v45, %v1818_v40  ;;  %v1860_v37 = vadd.f32 %v3520_v33, %v1819_v43  ;;  %v1861_v14 = vadd.f32 %v3522_v46, %v1820_v63  ;;  %v1780_v32 = vmul.f32 %v2669_v52, %v3402_v9 }
 0x2d3   : > { %v1781_v6 = vmul.f32 %v2669_v52, %v3405_v34  ;;  %v1782_v16 = vmul.f32 %v2669_v52, %v3408_v60  ;;  %v1766_v10 = vadd.f32 1e-05, %v1758_v35  ;;  %v1748_v55 = vpop.xlane.xlu0 %1747 }
 0x2d4   : > { %v2271_v24 = vpack.c.bf16 %v1860_v37, %v1859_v2  ;;  %v2272_v8 = vpack.c.bf16 %v1861_v14, %v1861_v14  ;;  %v1821_v42 = vmul.f32 %v3512_v48, %v1780_v32  ;;  %v1759_v18 = vmul.f32 0.0026041667, %v1748_v55 }
 0x2d5   : > { %v2671_v28 = vpop.eup %2670  ;;  %v1822_v54 = vmul.f32 %v3514_v23, %v1781_v6  ;;  %v1823_v0 = vmul.f32 %v3516_v44, %v1782_v16  ;;  %2676 = vrsqrt.f32 %v1766_v10 }
 0x2d6   : > { %1963 = vst [vmem:[%s3540_s16] sm:$0xff] %v2271_v24  ;;  %1964 = vst [vmem:[%s3540_s16 + $0x8] sm:$0xf] %v2272_v8  ;;  %v1862_v9 = vadd.f32 %v3518_v45, %v1821_v42  ;;  %v1783_v34 = vmul.f32 %v2671_v28, %v3417_v26  ;;  %v1784_v60 = vmul.f32 %v2671_v28, %v3420_v29  ;;  %v1767_v11 = vadd.f32 1e-05, %v1759_v18 }
 0x2d7   : > { %v1785_v61 = vmul.f32 %v2671_v28, %v3423_v36  ;;  %v1863_v38 = vadd.f32 %v3520_v33, %v1822_v54  ;;  %v1864_v1 = vadd.f32 %v3522_v46, %v1823_v0  ;;  %v1752_v15 = vpop.xlane.xlu1 %1751 }
 0x2d8   : > { %v1824_v30 = vmul.f32 %v3512_v48, %v1783_v34  ;;  %v1825_v47 = vmul.f32 %v3514_v23, %v1784_v60  ;;  %v1760_v56 = vmul.f32 0.0026041667, %v1752_v15  ;;  %2678 = vrsqrt.f32 %v1767_v11 }
 0x2d9   : > { %v1826_v39 = vmul.f32 %v3516_v44, %v1785_v61  ;;  %v2673_v26 = vpop.eup %2672  ;;  %v2273_v62 = vpack.c.bf16 %v1863_v38, %v1862_v9  ;;  %v2274_v29 = vpack.c.bf16 %v1864_v1, %v1864_v1 }
 0x2da   : > { %v1865_v36 = vadd.f32 %v3518_v45, %v1824_v30  ;;  %v1866_v21 = vadd.f32 %v3520_v33, %v1825_v47  ;;  %v1786_v12 = vmul.f32 %v2673_v26, %v3432_v19  ;;  %v1787_v13 = vmul.f32 %v2673_v26, %v3435_v20 }
 0x2db   : > { %v1867_v53 = vadd.f32 %v3522_v46, %v1826_v39  ;;  %1965 = vst [vmem:[%s3540_s16 + $0xc] sm:$0xff] %v2273_v62  ;;  %1966 = vst [vmem:[%s3540_s16 + $0x14] sm:$0xf] %v2274_v29  ;;  %v1788_v3 = vmul.f32 %v2673_v26, %v3438_v51  ;;  %v1768_v5 = vadd.f32 1e-05, %v1760_v56 }
 0x2dc   : > { %v2275_v25 = vpack.c.bf16 %v1866_v21, %v1865_v36  ;;  %v1827_v43 = vmul.f32 %v3512_v48, %v1786_v12  ;;  %v1828_v52 = vmul.f32 %v3514_v23, %v1787_v13 }
 0x2dd   : > { %v2276_v40 = vpack.c.bf16 %v1867_v53, %v1867_v53  ;;  %v2675_v63 = vpop.eup %2674  ;;  %v1829_v35 = vmul.f32 %v3516_v44, %v1788_v3  ;;  %2680 = vrsqrt.f32 %v1768_v5 }
 0x2de   : > { %1967 = vst [vmem:[%s3540_s16 + $0x18] sm:$0xff] %v2275_v25  ;;  %v1868_v19 = vadd.f32 %v3518_v45, %v1827_v43  ;;  %v1789_v20 = vmul.f32 %v2675_v63, %v3447_v22  ;;  %v1790_v51 = vmul.f32 %v2675_v63, %v3450_v49  ;;  %v1791_v2 = vmul.f32 %v2675_v63, %v3453_v41 }
 0x2df   : > { %1968 = vst [vmem:[%s3540_s16 + $0x20] sm:$0xf] %v2276_v40  ;;  %v1869_v37 = vadd.f32 %v3520_v33, %v1828_v52  ;;  %v1870_v14 = vadd.f32 %v3522_v46, %v1829_v35 }
 0x2e0   : > { %v1830_v32 = vmul.f32 %v3512_v48, %v1789_v20  ;;  %v1831_v6 = vmul.f32 %v3514_v23, %v1790_v51  ;;  %v1832_v16 = vmul.f32 %v3516_v44, %v1791_v2 }
 0x2e1   : > { %v2277_v10 = vpack.c.bf16 %v1869_v37, %v1868_v19  ;;  %v2278_v55 = vpack.c.bf16 %v1870_v14, %v1870_v14 }
 0x2e2   : > { %v2677_v24 = vpop.eup %2676  ;;  %v1871_v22 = vadd.f32 %v3518_v45, %v1830_v32  ;;  %v1872_v49 = vadd.f32 %v3520_v33, %v1831_v6  ;;  %v1873_v41 = vadd.f32 %v3522_v46, %v1832_v16 }
 0x2e3   : > { %1969 = vst [vmem:[%s3540_s16 + $0x24] sm:$0xff] %v2277_v10  ;;  %1970 = vst [vmem:[%s3540_s16 + $0x2c] sm:$0xf] %v2278_v55  ;;  %v1792_v8 = vmul.f32 %v2677_v24, %v3462_v27  ;;  %v1793_v42 = vmul.f32 %v2677_v24, %v3465_v4  ;;  %v1794_v18 = vmul.f32 %v2677_v24, %v3468_v58 }
 0x2e4   : > { %v2279_v28 = vpack.c.bf16 %v1872_v49, %v1871_v22  ;;  %v2280_v54 = vpack.c.bf16 %v1873_v41, %v1873_v41 }
 0x2e5   : > { %v1833_v0 = vmul.f32 %v3512_v48, %v1792_v8  ;;  %v1834_v9 = vmul.f32 %v3514_v23, %v1793_v42  ;;  %v1835_v34 = vmul.f32 %v3516_v44, %v1794_v18  ;;  %v2679_v60 = vpop.eup %2678 }
 0x2e6   : > { %1971 = vst [vmem:[%s3540_s16 + $0x30] sm:$0xff] %v2279_v28  ;;  %1972 = vst [vmem:[%s3540_s16 + $0x38] sm:$0xf] %v2280_v54  ;;  %v1795_v58 = vmul.f32 %v2679_v60, %v3477_v17  ;;  %v1796_v38 = vmul.f32 %v2679_v60, %v3480_v50  ;;  %v1797_v1 = vmul.f32 %v2679_v60, %v3483_v7 }
 0x2e7   : > { %v1874_v61 = vadd.f32 %v3518_v45, %v1833_v0  ;;  %v1875_v27 = vadd.f32 %v3520_v33, %v1834_v9  ;;  %v1876_v4 = vadd.f32 %v3522_v46, %v1835_v34 }
 0x2e8   : > { %v1836_v30 = vmul.f32 %v3512_v48, %v1795_v58  ;;  %v1837_v39 = vmul.f32 %v3514_v23, %v1796_v38  ;;  %v1838_v56 = vmul.f32 %v3516_v44, %v1797_v1 }
 0x2e9   : > { %v2281_v11 = vpack.c.bf16 %v1875_v27, %v1874_v61  ;;  %v2282_v15 = vpack.c.bf16 %v1876_v4, %v1876_v4 }
 0x2ea   : > { %v2681_v47 = vpop.eup %2680  ;;  %v1877_v26 = vadd.f32 %v3518_v45, %v1836_v30  ;;  %v1878_v62 = vadd.f32 %v3520_v33, %v1837_v39  ;;  %v1879_v29 = vadd.f32 %v3522_v46, %v1838_v56 }
 0x2eb   : > { %1973 = vst [vmem:[%s3540_s16 + $0x3c] sm:$0xff] %v2281_v11  ;;  %1974 = vst [vmem:[%s3540_s16 + $0x44] sm:$0xf] %v2282_v15  ;;  %v1798_v17 = vmul.f32 %v2681_v47, %v3492_v59  ;;  %v1799_v50 = vmul.f32 %v2681_v47, %v3495_v31  ;;  %v1800_v7 = vmul.f32 %v2681_v47, %v3498_v57 }
 0x2ec   : > { %v2283_v59 = vpack.c.bf16 %v1878_v62, %v1877_v26  ;;  %v2284_v31 = vpack.c.bf16 %v1879_v29, %v1879_v29 }
 0x2ed   : > { %v1839_v36 = vmul.f32 %v3512_v48, %v1798_v17  ;;  %v1840_v21 = vmul.f32 %v3514_v23, %v1799_v50  ;;  %v1841_v53 = vmul.f32 %v3516_v44, %v1800_v7 }
 0x2ee   : > { %1975 = vst [vmem:[%s3540_s16 + $0x48] sm:$0xff] %v2283_v59  ;;  %1976 = vst [vmem:[%s3540_s16 + $0x50] sm:$0xf] %v2284_v31 }
 0x2ef   : > { %v1880_v57 = vadd.f32 %v3518_v45, %v1839_v36  ;;  %v1881_v12 = vadd.f32 %v3520_v33, %v1840_v21  ;;  %v1882_v13 = vadd.f32 %v3522_v46, %v1841_v53 }
 0x2f1   : > { %v2285_v48 = vpack.c.bf16 %v1881_v12, %v1880_v57  ;;  %v2286_v23 = vpack.c.bf16 %v1882_v13, %v1882_v13 }
 0x2f3   : > { %1977 = vst [vmem:[%s3540_s16 + $0x54] sm:$0xff] %v2285_v48  ;;  %1978 = vst [vmem:[%s3540_s16 + $0x5c] sm:$0xf] %v2286_v23 }
 0x2f4   : > { %2775 = shalt.err (!%p2772_p5)
}
 0x2f5   : > { %s2776_s14 = scalar_lea.hbm %s3618_s8, 1536  ;;  %s2780_s30 = scalar_lea.hbm %s3675_s5, 3072 }
 0x2f6   : > { %p2777_p10 = scmp.ne.s32.totalorder %s3618_s8, %s2776_s14  ;;  %p2781_p6 = scmp.lt.s32.totalorder %s3618_s8, %s3675_s5 }
 0x2f7   : > { %p2782_p12 = scmp.lt.s32.totalorder %s2780_s30, %s2776_s14 }
 0x2f8   : > { %p2778_p1 = pnand %p2777_p10, %p2984_p7 }
 0x2f9   : > { %p2783_p3 = por %p2782_p12, %p2781_p6 }
 0x2fa   : > { %p2779_p4 = pneg %p2778_p1 }
 0x2fc   : > { %p2784_p8 = pnand %p2783_p3, %p2779_p4 }
 0x2fe   : > { %2787 = shalt.err (!%p2784_p8)
}
 0x2ff   : > { %s2857_s16 = smov 192   ;;  %s2858_s27 = smov 12  }
 0x300   : > { %2410 = dma.vmem_to_hbm [thread:$0]  (%p2984_p7), %s3620_s17, 1536, %s3618_s8, %s1980_s6, %s2857_s16, %s2857_s16, %s2858_s27  }
 0x301 PF: > { %s2011_s21 = sand.u32 1, %s2826_s18   ;;  %p3731_p9 = scmp.ne.s32.totalorder %s3684_s29, 0 }
 0x302   : > { %p3732_p11 = scmp.ge.s32.totalorder %s2846_s23, 2  ;;  %s2012_s24 = scalar_lea.sflag [#allocation4], %s2011_s21 }
 0x304   : > { %p2424_p2 = pnand %p3732_p11, %p3731_p9 }
 0x306   : > { %p2425_p13 = pneg %p2424_p2 }
 0x308   : > { %2821 = dma.done.wait (%p2425_p13), %s2012_s24, 1536  }
 0x309   : > { %2823 = vsyncadd (%p2425_p13), %s2012_s24, 4294965760  ;;  %s22_s23 = sadd.s32 1, %s2846_s23   ;;  %s3733_s18 = smov %s2830_s19 }
 0x30a   : > { %p19_p0 = scmp.ge.s32.totalorder %s22_s23, 4   ;;  %s3734_s19 = smov %s2834_s20 }
 0x30b   : > { %s3735_s20 = smov %s2996_s12  ;;  %s3736_s21 = smov %s2842_s22 }
 0x30c   : > { %s3737_s22 = smov %s3739_s25  ;;  %21 = sbr.rel (!%p19_p0) target bundleno = 10 (0xa), region = 93 }
 0x311   :  { %2017 = vsyncpa [#allocation3], 1 }
 0x312   :  { %2019 = vsyncpa [#allocation3 + $0x1], 1 }
 0x313   :  { %2020 = vsyncpa [#allocation6], 1 }
 0x314   :  { %2021 = vsyncpa [#allocation4], 1 }
 0x315   :  { %2023 = vsyncpa [#allocation4 + $0x1], 1 }

</bundles_post_ra>
